<compile_context>
chip_gen: v7x
topology: tpu7x:2x2x1
jax: 0.10.0
libtpu: 0.0.40
codegen_flags: <defaults>
</compile_context>

<pallas_src>
import calendar
import math
from calendar import monthrange
from datetime import datetime
from functools import partial

import jax
import jax.numpy as jnp
import numpy as np
from jax import lax
from jax.experimental import pallas as pl
from jax.experimental.pallas import tpu as pltpu

LANE = 128
SUBLANE = 8


def _iris_kernel(enc_ref, w_ref, b_ref, out_ref, *, lin_col, om1):
    # enc_ref: (TB, KP)       cols[0:IN]=features, col lin_col=unix*w0+b0, rest 0
    # w_ref:   (KP, OUT_PAD)  w zero-padded to KP rows / 128 lanes (VMEM-resident)
    # b_ref:   (IN, OUT_PAD)  b zero-padded to 128 lanes          (VMEM-resident)
    # out_ref: (TB, IN, OUT_PAD)
    feats = enc_ref[...]                                        # (TB, KP)

    # Single MXU matmul for the whole batch tile (K and N padded host-side).
    proj = jnp.dot(feats, w_ref[...],
                   preferred_element_type=jnp.float32)          # (TB, OUT_PAD)

    # Broadcast-add bias over the IN rows of every date.
    z = proj[:, None, :] + b_ref[...][None, :, :]               # (TB, IN, OUT_PAD)

    # Per-date scalar affine column (read straight from the enc tile; exact).
    lin = feats[:, lin_col:lin_col + 1][:, None, :]             # (TB, 1, 1)

    # Build the full lane-dense tile in registers and issue ONE unmasked store:
    #   lanes [0:om1)  -> sin(enc @ w + b)
    #   lane  om1      -> unix*w0 + b0
    #   lanes (om1:128)-> 0  (sliced away in the wrapper)
    lane = lax.broadcasted_iota(jnp.int32, z.shape, 2)
    out_ref[...] = jnp.where(lane < om1, jnp.sin(z),
                             jnp.where(lane == om1, lin, 0.0))


def iris_time_encode(enc_aug, w_pad, b_pad, out_features, *, tb=256):
    """enc_aug: (B, KP) f32, w_pad: (KP, OUT_PAD) f32, b_pad: (IN, OUT_PAD) f32.

    Returns (B, IN, out_features) f32, matching IrisTimeEncoder per-date output.
    """
    batch, kp = enc_aug.shape
    in_features, out_pad = b_pad.shape
    om1 = out_features - 1
    lin_col = in_features                      # column holding unix*w0 + b0

    # Batch tile: a multiple of 8 sublanes, capped by the (padded) batch.
    # Double-buffered output block ~= tb * 16 * 128 * 4 B * 2 ≈ tb * 16 KiB,
    # so tb<=1024 stays well under the 16 MiB (v5e) / 32 MiB (v6e, v7x)
    # default scoped-VMEM limits.
    tb = max(SUBLANE, (int(tb) // SUBLANE) * SUBLANE)
    tb = min(tb, pl.cdiv(batch, SUBLANE) * SUBLANE)
    batch_pad = pl.cdiv(batch, tb) * tb
    if batch_pad != batch:
        enc_aug = jnp.pad(enc_aug, ((0, batch_pad - batch), (0, 0)))

    out = pl.pallas_call(
        partial(_iris_kernel, lin_col=lin_col, om1=om1),
        out_shape=jax.ShapeDtypeStruct((batch_pad, in_features, out_pad),
                                       jnp.float32),
        grid_spec=pltpu.PrefetchScalarGridSpec(
            num_scalar_prefetch=0,
            grid=(batch_pad // tb,),
            in_specs=[
                pl.BlockSpec((tb, kp), lambda i: (i, 0)),              # enc tile
                pl.BlockSpec((kp, out_pad), lambda i: (0, 0)),         # w (resident)
                pl.BlockSpec((in_features, out_pad), lambda i: (0, 0)),  # b (resident)
            ],
            out_specs=pl.BlockSpec((tb, in_features, out_pad),
                                   lambda i: (i, 0, 0)),
        ),
        compiler_params=pltpu.CompilerParams(
            dimension_semantics=("parallel",)),
    )(enc_aug, w_pad, b_pad)

    # Layout plumbing back to the logical shape.
    return out[:batch, :, :out_features]


# ----------------------------------------------------------------------------
# Host-side glue: replicate the PyTorch forward's date -> feature construction.
# ----------------------------------------------------------------------------
def build_time_components(start_date, claim_date):
    days_in_month = monthrange(claim_date.year, claim_date.month)[1]
    time_components = [
        claim_date.minute / 60.0,
        claim_date.hour / 24.0,
        claim_date.day / days_in_month,
        claim_date.month / 12.0,
        (claim_date.year - start_date.year) / 1000.0,
    ]
    unix_time = float(calendar.timegm(claim_date.timetuple()))
    return time_components, unix_time


def build_enc_row(frequencies, time_components):
    enc = []
    for freq_tuple, value in zip(frequencies, time_components):
        for f in freq_tuple:
            enc.append(math.sin(2.0 * math.pi * f * value))
            enc.append(math.cos(2.0 * math.pi * f * value))
    return np.asarray(enc, dtype=np.float32)   # (IN,) == (10,) for defaults


if __name__ == "__main__":
    # Module config (default frequencies => in_features must be 10).
    frequencies = [(1,)] * 5
    in_features = 2 * sum(len(t) for t in frequencies)     # 10
    out_features = 33                                       # small, arbitrary
    om1 = out_features - 1

    kp = pl.cdiv(in_features + 1, SUBLANE) * SUBLANE        # 16 (feat + lin + pad)
    out_pad = pl.cdiv(out_features, LANE) * LANE            # 128 (lane-dense)

    # Deterministic parameter init (stand-in for torch.randn).
    key = jax.random.PRNGKey(0)
    k0, k1, k2, k3 = jax.random.split(key, 4)
    w0 = jax.random.normal(k0, (1,), dtype=jnp.float32)
    b0 = jax.random.normal(k1, (1,), dtype=jnp.float32)
    w = jax.random.normal(k2, (in_features, om1), dtype=jnp.float32)
    b = jax.random.normal(k3, (in_features, om1), dtype=jnp.float32)

    w_np = np.asarray(w, dtype=np.float32)
    b_np = np.asarray(b, dtype=np.float32)
    w0_np = np.asarray(w0, dtype=np.float32)[0]
    b0_np = np.asarray(b0, dtype=np.float32)[0]

    # Padded parameter slabs (built once, VMEM-resident across the grid).
    w_pad_np = np.zeros((kp, out_pad), dtype=np.float32)
    w_pad_np[:in_features, :om1] = w_np
    b_pad_np = np.zeros((in_features, out_pad), dtype=np.float32)
    b_pad_np[:, :om1] = b_np

    # A batch of deterministic (start_date, claim_date) pairs in ONE call.
    start_date = datetime(2020, 1, 1)
    batch = 16
    claim_dates = [
        datetime(2021 + (i % 4), 1 + ((i * 3) % 12), 1 + ((i * 5) % 27),
                 (i * 7) % 24, (i * 11) % 60)
        for i in range(batch)
    ]

    enc_aug_np = np.zeros((batch, kp), dtype=np.float32)
    for i, cd in enumerate(claim_dates):
        tc, unix_time = build_time_components(start_date, cd)
        enc_aug_np[i, :in_features] = build_enc_row(frequencies, tc)
        # Host-side scalar affine in float32, exactly as torch does.
        enc_aug_np[i, in_features] = np.float32(
            np.float32(unix_time) * w0_np + b0_np)

    enc_aug = jnp.asarray(enc_aug_np)
    w_pad = jnp.asarray(w_pad_np)
    b_pad = jnp.asarray(b_pad_np)

    # tb=8 at this toy batch so the 1-D batch grid (grid=(2,)) is exercised;
    # for real workloads the default tb=256 amortizes the per-step overhead.
    out = iris_time_encode(enc_aug, w_pad, b_pad, out_features, tb=8)
    out = jax.block_until_ready(out)

    # Pure-numpy reference (float32 throughout, matching torch semantics).
    refs = []
    for i in range(batch):
        enc_row = enc_aug_np[i:i + 1, :in_features]            # (1, IN)
        combined_ref = np.sin(enc_row @ w_np + b_np)           # (IN, OM1)
        lin_ref = np.broadcast_to(enc_aug_np[i, in_features],
                                  (in_features, 1)).astype(np.float32)
        refs.append(np.concatenate([combined_ref, lin_ref], axis=1))
    ref = np.stack(refs, axis=0)                               # (B, IN, OUT)

    assert out.shape == (batch, in_features, out_features)
    assert np.allclose(np.asarray(out), ref, rtol=1e-4, atol=1e-3), (
        "mismatch vs reference"
    )

    print("KERNEL_OK")
</pallas_src>

<mosaic_0001>
module attributes {stable_mosaic.version = 11 : i64} {
  func.func @_iris_kernel(%arg0: i32, %arg1: memref<8x16xf32, #tpu.memory_space<vmem>>, %arg2: memref<16x128xf32, #tpu.memory_space<vmem>>, %arg3: memref<10x128xf32, #tpu.memory_space<vmem>>, %arg4: memref<8x10x128xf32, #tpu.memory_space<vmem>>) attributes {dimension_semantics = [#tpu.dimension_semantics<parallel>], iteration_bounds = array<i64: 2>, scalar_prefetch = 0 : i64, scratch_operands = 0 : i64, tpu.core_type = #tpu.core_type<tc>, window_params = [{transform_indices = @transform_0, window_bounds = array<i64: 8, 16>}, {pipeline_mode = #tpu.pipeline_mode<synchronous>, transform_indices = @transform_1, window_bounds = array<i64: 16, 128>}, {pipeline_mode = #tpu.pipeline_mode<synchronous>, transform_indices = @transform_2, window_bounds = array<i64: 10, 128>}, {transform_indices = @transform_3, window_bounds = array<i64: 8, 10, 128>}]} {
    %c0 = arith.constant 0 : index
    %c0_0 = arith.constant 0 : index
    %0 = vector.load %arg1[%c0, %c0_0] : memref<8x16xf32, #tpu.memory_space<vmem>>, vector<8x16xf32>
    %c0_1 = arith.constant 0 : index
    %c0_2 = arith.constant 0 : index
    %1 = vector.load %arg2[%c0_1, %c0_2] : memref<16x128xf32, #tpu.memory_space<vmem>>, vector<16x128xf32>
    %cst = arith.constant dense<0.000000e+00> : vector<8x128xf32>
    %2 = tpu.matmul %0, %1, %cst {dimension_numbers = #tpu.dot_dimension_numbers<[1], [0], [0], [1], [0, 0, 1, 1], [], []>} : vector<8x16xf32>, vector<16x128xf32>, vector<8x128xf32> -> vector<8x128xf32>
    %3 = vector.shape_cast %2 : vector<8x128xf32> to vector<8x1x128xf32>
    %c0_3 = arith.constant 0 : index
    %c0_4 = arith.constant 0 : index
    %4 = vector.load %arg3[%c0_3, %c0_4] : memref<10x128xf32, #tpu.memory_space<vmem>>, vector<10x128xf32>
    %5 = vector.shape_cast %4 : vector<10x128xf32> to vector<1x10x128xf32>
    %6 = vector.broadcast %3 : vector<8x1x128xf32> to vector<8x10x128xf32>
    %7 = vector.broadcast %5 : vector<1x10x128xf32> to vector<8x10x128xf32>
    %8 = arith.addf %6, %7 : vector<8x10x128xf32>
    %9 = vector.extract_strided_slice %0 {offsets = [0, 10], sizes = [8, 1], strides = [1, 1]} : vector<8x16xf32> to vector<8x1xf32>
    %10 = vector.shape_cast %9 : vector<8x1xf32> to vector<8x1x1xf32>
    %11 = tpu.iota {dimensions = array<i32: 2>} : vector<8x10x128xi32>
    %c32_i32 = arith.constant 32 : i32
    %12 = vector.broadcast %c32_i32 : i32 to vector<8x10x128xi32>
    %13 = arith.cmpi slt, %11, %12 : vector<8x10x128xi32>
    %14 = math.sin %8 : vector<8x10x128xf32>
    %c32_i32_5 = arith.constant 32 : i32
    %15 = vector.broadcast %c32_i32_5 : i32 to vector<8x10x128xi32>
    %16 = arith.cmpi eq, %11, %15 : vector<8x10x128xi32>
    %cst_6 = arith.constant 0.000000e+00 : f32
    %17 = vector.shape_cast %10 : vector<8x1x1xf32> to vector<8x1x1xf32>
    %18 = vector.broadcast %17 : vector<8x1x1xf32> to vector<8x10x128xf32>
    %19 = vector.broadcast %cst_6 : f32 to vector<8x10x128xf32>
    %20 = arith.select %16, %18, %19 : vector<8x10x128xi1>, vector<8x10x128xf32>
    %21 = arith.select %13, %14, %20 : vector<8x10x128xi1>, vector<8x10x128xf32>
    %c0_7 = arith.constant 0 : index
    %c0_8 = arith.constant 0 : index
    %c0_9 = arith.constant 0 : index
    %22 = vector.load %arg4[%c0_7, %c0_8, %c0_9] : memref<8x10x128xf32, #tpu.memory_space<vmem>>, vector<8x10x128xf32>
    tpu.vector_store %arg4[%c0_7, %c0_8, %c0_9], %21 {strides = array<i32>} : memref<8x10x128xf32, #tpu.memory_space<vmem>>, vector<8x10x128xf32>,
    return
  }
  func.func @transform_0(%arg0: i32) -> (i32, i32) {
    %c0_i32 = arith.constant 0 : i32
    %c0_i32_0 = arith.constant 0 : i32
    return %arg0, %c0_i32 : i32, i32
  }
  func.func @transform_1(%arg0: i32) -> (i32, i32) {
    %c0_i32 = arith.constant 0 : i32
    %c0_i32_0 = arith.constant 0 : i32
    %c0_i32_1 = arith.constant 0 : i32
    return %c0_i32, %c0_i32_0 : i32, i32
  }
  func.func @transform_2(%arg0: i32) -> (i32, i32) {
    %c0_i32 = arith.constant 0 : i32
    %c0_i32_0 = arith.constant 0 : i32
    %c0_i32_1 = arith.constant 0 : i32
    return %c0_i32, %c0_i32_0 : i32, i32
  }
  func.func @transform_3(%arg0: i32) -> (i32, i32, i32) {
    %c0_i32 = arith.constant 0 : i32
    %c0_i32_0 = arith.constant 0 : i32
    %c0_i32_1 = arith.constant 0 : i32
    return %arg0, %c0_i32, %c0_i32_0 : i32, i32, i32
  }
}

</mosaic_0001>

<bundles_post_ra>
// kernel: tpu_custom_call.1
= control target key start
LH: loop header
LB: loop body
LE: loop exit
PB: predicated region body
PF: predicated region fallthrough
CT: control target
= control target key end

     0   :  { %8 = vsyncpa [#allocation3], 0  ;;  %s4659_s0 = inlined_call_operand.hbm [shape: f32[16,16], index: 0, kind: input, shape index: {}]   ;;  %s4660_s1 = inlined_call_operand.hbm [shape: f32[16,128], index: 1, kind: input, shape index: {}]   ;;  %s4661_s2 = inlined_call_operand.hbm [shape: f32[10,128], index: 2, kind: input, shape index: {}]   ;;  %s4662_s3 = inlined_call_operand.vmem [shape: f32[16,10,128], index: 3, kind: output, shape index: {}]  }
   0x1   :  { %10 = vsyncpa [#allocation3 + $0x1], 0 }
   0x2   :  { %11 = vsyncpa [#allocation5], 0  ;;  %s2776_s12 = smov 0   ;;  %s2778_s13 = smov 0  }
   0x3   :  { %s2780_s14 = smov 0   ;;  %s2782_s15 = smov 0  }
   0x4 LB: > { %s2314_s16 = sadd.s32 4294967295, %s2738_s15   ;;  %p37_p0 = scmp.ne.s32.totalorder %s2730_s13, %s2726_s12  ;;  %s2738_s15 = sphi %s2782_s15, %s4747_s15   ;;  %s2734_s14 = sphi %s2780_s14, %s4746_s14   ;;  %s2730_s13 = sphi %s2778_s13, %s4745_s13   ;;  %s2726_s12 = sphi %s2776_s12, %s4744_s12  }
   0x5   : > { %p2798_p1 = scmp.eq.s32.totalorder %s2314_s16, 0  ;;  %p2316_p2 = scmp.ge.s32.totalorder %s2738_s15, 1 }
   0x6   : > { %p116_p3 = scmp.lt.s32.totalorder %s2738_s15, 3  ;;  %s2740_s20 = smov [#allocation4]  }
   0x7   : > { %s4686_s17 = scalar_select %p2798_p1, 1, 0 }
   0x8   : > { %p2806_p4 = por %p2798_p1, %p37_p0  ;;  %p2810_p5 = pnand %p2316_p2, %p116_p3 }
   0x9   : > { %s128_s21 = sshll.u32 %s2740_s20, 4  ;;  %s2741_s23 = smov [#allocation6]   ;;  %s129_s21 = int_to_ptr.vmem [resolvable:$true] %s128_s21 }
   0xa   : > { %s4687_s18 = scalar_select %p2806_p4, 1, 0 }
   0xb   : > { %s4688_s19 = scalar_select %p2810_p5, 1, 0 }
   0xc   : > { %p2484_p6 = pneg %p2810_p5  ;;  %s141_s24 = sshll.u32 %s2741_s23, 4  ;;  %s2822_s24 = int_to_ptr.vmem [resolvable:$true] %s141_s24 }
   0xd   : > { %s2614_s27 = scalar_lea.hbm %s4660_s1, 256 }
   0xe   : > { %p2818_p7 = pnand %p2484_p6, %p2798_p1  ;;  %p2615_p8 = scmp.ne.s32.totalorder %s4660_s1, %s2614_s27 }
   0xf   : > { %p2621_p12 = scmp.lt.u32.totalorder %s2614_s27, %s4660_s1 }
  0x10   : > { %p2616_p9 = pneg %p2818_p7 }
  0x12   : > { %p2617_p10 = pnand %p2616_p9, %p2615_p8 }
  0x14   : > { %p2618_p11 = pneg %p2617_p10 }
  0x16   : > { %p2623_p13 = pnand %p2621_p12, %p2618_p11 }
  0x18   : > { %2626 = shalt.err (!%p2623_p13)
}
  0x19   : > { %s2627_s5 = scalar_lea.vmem %s129_s21, 256  ;;  %p2635_p6 = scmp.lt.s32.totalorder %s129_s21, %s129_s21 }
  0x1a   : > { %p2628_p0 = scmp.ne.s32.totalorder %s129_s21, %s2627_s5  ;;  %p2636_p1 = scmp.lt.s32.totalorder %s2627_s5, %s2627_s5 }
  0x1c   : > { %p2630_p2 = pnand %p2628_p0, %p2616_p9  ;;  %p2637_p4 = por %p2636_p1, %p2635_p6 }
  0x1e   : > { %p2631_p3 = pneg %p2630_p2 }
  0x20   : > { %p2638_p5 = pnand %p2637_p4, %p2631_p3 }
  0x22   : > { %2641 = shalt.err (!%p2638_p5)
}
  0x23   : > { %s2742_s6 = smov 128   ;;  %s2743_s7 = smov 8  }
  0x24   : > { %2487 = dma.hbm_to_vmem [thread:$0]  (!%p2818_p7), %s4660_s1, 256, %s129_s21, [#allocation5], %s2742_s6, %s2742_s6, %s2743_s7  }
  0x25   : > { %s2642_s12 = scalar_lea.hbm %s4661_s2, 256 }
  0x26   : > { %p2643_p8 = scmp.ne.s32.totalorder %s4661_s2, %s2642_s12  ;;  %p2649_p5 = scmp.lt.u32.totalorder %s2642_s12, %s4661_s2 }
  0x28   : > { %p2645_p1 = pnand %p2643_p8, %p2616_p9 }
  0x2a   : > { %p2646_p4 = pneg %p2645_p1 }
  0x2c   : > { %p2651_p10 = pnand %p2649_p5, %p2646_p4 }
  0x2e   : > { %2654 = shalt.err (!%p2651_p10)
}
  0x2f   : > { %s2655_s21 = scalar_lea.vmem %s2822_s24, 256  ;;  %p2663_p0 = scmp.lt.s32.totalorder %s2822_s24, %s2822_s24 }
  0x30   : > { %p2656_p11 = scmp.ne.s32.totalorder %s2822_s24, %s2655_s21  ;;  %p2664_p2 = scmp.lt.s32.totalorder %s2655_s21, %s2655_s21 }
  0x32   : > { %p2658_p12 = pnand %p2656_p11, %p2616_p9  ;;  %p2665_p3 = por %p2664_p2, %p2663_p0 }
  0x34   : > { %p2659_p13 = pneg %p2658_p12 }
  0x36   : > { %p2666_p6 = pnand %p2665_p3, %p2659_p13 }
  0x38   : > { %2669 = shalt.err (!%p2666_p6)
}
  0x39   : > { %2490 = dma.hbm_to_vmem [thread:$0]  (!%p2818_p7), %s4661_s2, 256, %s2822_s24, [#allocation5], %s2742_s6, %s2742_s6, %s2743_s7  }
  0x3a   : > { %s2872_s29 = sadd.s32 1, %s2738_s15   ;;  %s24_s30 = sadd.s32 1, %s2734_s14 }
  0x3b   : > { %s21_s22 = ssub.s32 %s2738_s15, %s2872_s29  ;;  %p31_p9 = scmp.ne.s32.totalorder %s2734_s14, %s2730_s13 }
  0x3c   : > { %p22_p8 = scmp.eq.s32.totalorder %s21_s22, 0  ;;  %p32_p1 = scmp.eq.s32.totalorder %s2738_s15, 0 }
  0x3d   : > { %p2497_p4 = scmp.lt.s32.totalorder %s2738_s15, 2  ;;  %s155_s4 = sand.u32 1, %s2734_s14  }
  0x3e   : > { %s2883_s5 = scalar_select %p22_p8, %s2734_s14, %s24_s30  }
  0x3f   : > { %p33_p5 = por %p32_p1, %p31_p9  ;;  %s2320_s8 = sshll.u32 %s155_s4, 3 }
  0x40   : > { %s2321_s9 = sshll.u32 %s2738_s15, 7  ;;  %s159_s24 = scalar_lea.vmem [#allocation2], %s2320_s8 }
  0x41   : > { %s2889_s12 = scalar_lea.hbm %s4659_s0, %s2321_s9  ;;  %s166_s6 = sshll.u32 %s159_s24, 4  ;;  %s2895_s6 = int_to_ptr.vmem [resolvable:$true] %s166_s6 }
  0x42   : > { %p2891_p7 = pnand %p2497_p4, %p33_p5  ;;  %s156_s20 = scalar_lea.sflag [#allocation3], %s155_s4 }
  0x43   : > { %s2670_s23 = scalar_lea.hbm %s2889_s12, 128  ;;  %s2675_s21 = scalar_lea.hbm %s4659_s0, 256 }
  0x44   : > { %p2671_p10 = scmp.ne.s32.totalorder %s2889_s12, %s2670_s23  ;;  %p2672_p11 = pneg %p2891_p7 }
  0x45   : > { %p2676_p0 = scmp.lt.u32.totalorder %s2889_s12, %s4659_s0  ;;  %p2677_p2 = scmp.lt.u32.totalorder %s2675_s21, %s2670_s23 }
  0x46   : > { %p2673_p12 = pnand %p2672_p11, %p2671_p10  ;;  %p2679_p6 = scmp.lt.u32.totalorder %s2670_s23, %s2889_s12 }
  0x47   : > { %p2678_p3 = por %p2677_p2, %p2676_p0 }
  0x48   : > { %p2674_p13 = pneg %p2673_p12 }
  0x49   : > { %p2680_p9 = por %p2679_p6, %p2678_p3 }
  0x4b   : > { %p2681_p8 = pnand %p2680_p9, %p2674_p13 }
  0x4d   : > { %2684 = shalt.err (!%p2681_p8)
}
  0x4e   : > { %s2685_s30 = scalar_lea.vmem %s2895_s6, 128  ;;  %s2744_s22 = smov [#allocation2]  }
  0x4f   : > { %p2686_p1 = scmp.ne.s32.totalorder %s2895_s6, %s2685_s30  ;;  %s2690_s4 = sshll.u32 %s2744_s22, 4  ;;  %s2691_s4 = int_to_ptr.vmem [resolvable:$false] %s2690_s4 }
  0x50   : > { %s2692_s8 = scalar_lea.vmem %s2691_s4, 256  ;;  %p2693_p10 = scmp.lt.s32.totalorder %s2895_s6, %s2691_s4 }
  0x51   : > { %p2688_p4 = pnand %p2686_p1, %p2672_p11  ;;  %p2694_p12 = scmp.lt.s32.totalorder %s2692_s8, %s2685_s30 }
  0x53   : > { %p2689_p5 = pneg %p2688_p4  ;;  %p2695_p0 = por %p2694_p12, %p2693_p10 }
  0x55   : > { %p2696_p2 = pnand %p2695_p0, %p2689_p5 }
  0x57   : > { %2699 = shalt.err (!%p2696_p2)
}
  0x58   : > { %2494 = dma.hbm_to_vmem [thread:$0]  (!%p2891_p7), %s2889_s12, 128, %s2895_s6, %s156_s20  }
  0x59   : > { %p4691_p13 = scmp.ne.s32.totalorder %s4688_s19, 0 }
  0x5b   : > { %175 = sbr.rel (%p4691_p13) target bundleno = 779 (0x30b), region = 32 }
  0x62   : > { %s177_s9 = sand.u32 1, %s2730_s13   ;;  %p4692_p11 = scmp.ne.s32.totalorder %s4687_s18, 0 }
  0x63   : > { %s2323_s10 = sshll.u32 %s177_s9, 3  ;;  %s178_s11 = scalar_lea.sflag [#allocation3], %s177_s9 }
  0x64   : > { %s181_s24 = scalar_lea.vmem [#allocation2], %s2323_s10 }
  0x65   : > { %2717 = dma.done.wait (%p4692_p11), %s178_s11, 128  }
  0x66   : > { %2719 = vsyncadd (%p4692_p11), %s178_s11, 4294967168  ;;  %p4693_p3 = scmp.ne.s32.totalorder %s4686_s17, 0 }
  0x68   : > { %2721 = dma.done.wait (%p4693_p3), [#allocation5], 512  }
  0x69   : > { %2723 = vsyncadd (%p4693_p3), [#allocation5], 4294966784  ;;  %v302_v0 = vlaneseq  ;;  %v2745_v1 = vmov 0.0|0.0   ;;  %vm2746_vm0 = vmmov 0   ;;  %v2747_v2 = vmov 0.0   ;;  %v220_v9 = vld [vmem:[%s181_s24] sm:$0xff] }
  0x6a   : > { %2407 = vmatprep.subr.bf16.mxu0 %v2745_v1  ;;  %2404 = vmatprep.mubr.msk.f32.mxu0 %vm2746_vm0, %v2747_v2  ;;  %v2748_v3 = vmov 10   ;;  %v2749_v4 = vmov 1966171168   ;;  %v221_v10 = vld [vmem:[#allocation4] sm:$0xff]  ;;  %v222_v11 = vld [vmem:[#allocation4 + $0x8] sm:$0xff]  ;;  %v405_v15 = vcombine.high %v220_v9, %v220_v9  ;;  %vm223_vm1 = vcmask 130048  }
  0x6b   : > { %2548 = vset.pattern.permute.xlu1 %v2748_v3  ;;  %v300_v5 = vunpack.c.l.s4 %v2749_v4  ;;  %v303_v6 = vshrl.u32 %v302_v0, 7  ;;  %2547 = vset.pattern.permute.xlu0 %v2748_v3  ;;  %v2408_v12 = vpack.c.bf16 %v222_v11, %v221_v10  ;;  %v2962_v41 = vld [vmem:[#allocation6] sm:$0xff]  ;;  %v2966_v43 = vld [vmem:[#allocation6 + $0x8] sm:$0x3]  ;;  %v4678_v11 = vmov 683565275  }
  0x6c   : > { %s4462_s17 = sshll.u32 %s2314_s16, 3 }
  0x6d   : > { %v301_v7 = vunpack.c.0.s8 %v300_v5  ;;  %v2936_v13 = vsub.s32 0, %v303_v6  ;;  %2409 = vmatpush3.bf16.msra.mxu0 %v2408_v12  ;;  %p214_p7 = scmp.lt.s32.totalorder %s4462_s17, 15 }
  0x6f   : > { %v2934_v8 = vsub.s32 %v301_v7, %v303_v6  ;;  %s4749_s17 = smov (!%p214_p7, %s4462_s17), 15 }
  0x70   : > { %2405 = vmatmul.mubr.msk.f32.vlgmr.msra.gmra.mrb[0].mxu0 %vm223_vm1, %v220_v9  ;;  %s2396_s15 = sshll.u32 %s4749_s17, 4 }
  0x71   : > { %v412_v14 = vrot.slane %v220_v9, %v2934_v8  ;;  %v419_v18 = vrot.slane %v405_v15, %v2934_v8  ;;  %s4530_s19 = scalar_lea.vmem %s4662_s3, %s2396_s15 }
  0x73   : > { %v428_v16 = vrot.slane %v412_v14, %v2934_v8  ;;  %v420_v17 = vcombine.high %v412_v14, %v412_v14  ;;  %v421_v22 = vcombine.high %v419_v18, %v419_v18  ;;  %v435_v26 = vrot.slane %v419_v18, %v2934_v8 }
  0x74   : > { %v4672_v18 = vmov 2131351028  }
  0x75   : > { %v2125_v19 = vrot.slane %v428_v16, %v2936_v13  ;;  %v450_v20 = vcombine.high %v428_v16, %v428_v16  ;;  %v442_v21 = vrot.slane %v420_v17, %v2934_v8  ;;  %v449_v28 = vrot.slane %v421_v22, %v2934_v8 }
  0x76   : > { %v2141_v29 = vrot.slane %v435_v26, %v2936_v13  ;;  %v451_v30 = vcombine.high %v435_v26, %v435_v26  ;;  %v4674_v16 = vmov 2475754826   ;;  %v4682_v22 = vmov 920167782  }
  0x77   : > { %2155 = vperm.xlu0 %2547, %v2125_v19   ;;  %v2133_v23 = vrot.slane %v450_v20, %v2936_v13  ;;  %v2129_v24 = vrot.slane %v442_v21, %v2936_v13  ;;  %v452_v25 = vcombine.high %v442_v21, %v442_v21  ;;  %v2145_v31 = vrot.slane %v449_v28, %v2936_v13 }
  0x78   : > { %v453_v32 = vcombine.high %v449_v28, %v449_v28  ;;  %v2149_v33 = vrot.slane %v451_v30, %v2936_v13  ;;  %v4670_v20 = vmov 2102212464  }
  0x79   : > { %2163 = vperm.xlu1 %2548, %v2133_v23   ;;  %v2137_v27 = vrot.slane %v452_v25, %v2936_v13 }
  0x7a   : > { %v2153_v34 = vrot.slane %v453_v32, %v2936_v13 }
  0x7b   : > { %2159 = vperm.xlu0 %2547, %v2129_v24  }
  0x7d   : > { %2167 = vperm.xlu1 %2548, %v2137_v27  }
  0x7f   : > { %2171 = vperm.xlu0 %2547, %v2141_v29   ;;  %v4680_v29 = vmov 1326507024  }
  0x81   : > { %2175 = vperm.xlu1 %2548, %v2145_v31  }
  0x83   : > { %2179 = vperm.xlu0 %2547, %v2149_v33  }
  0x85   : > { %2183 = vperm.xlu1 %2548, %v2153_v34  }
 0x143   : > { %v2952_v35 = vpop.f32.mrb[0].mxu0 }
 0x144   : > { %v2406_v36 = vpop.f32.mrb[1].mxu0  ;;  %v305_v37 = vrot.slane %v2952_v35, %v2934_v8 }
 0x146   : > { %v313_v38 = vcombine.high %v305_v37, %v305_v37  ;;  %v2957_v39 = vrot.slane %v305_v37, %v2934_v8 }
 0x148   : > { %v2960_v40 = vrot.slane %v313_v38, %v2934_v8  ;;  %v352_v42 = vrot.slane %v2957_v39, %v2936_v13 }
 0x14a   : > { %v2969_v44 = vadd.f32 %v352_v42, %v2962_v41  ;;  %v2973_v45 = vrot.slane %v2960_v40, %v2936_v13  ;;  %v2976_v46 = vadd.f32 %v352_v42, %v2966_v43 }
 0x14c   : > { %v457_v47 = vand.u32 2147483647, %v2969_v44  ;;  %v2981_v48 = vadd.f32 %v2973_v45, %v2962_v41  ;;  %v460_v49 = vand.u32 2139095040, %v2969_v44  ;;  %v561_v50 = vand.u32 2147483647, %v2976_v46 }
 0x14d   : > { %v564_v51 = vand.u32 2139095040, %v2976_v46 }
 0x14e   : > { %v461_v52 = vshrl.u32 %v460_v49, 23  ;;  %v464_v53 = vand.u32 8388607, %v457_v47  ;;  %v568_v55 = vand.u32 8388607, %v561_v50  ;;  %v668_v57 = vand.u32 2139095040, %v2981_v48 }
 0x14f   : > { %v565_v54 = vshrl.u32 %v564_v51, 23 }
 0x150   : > { %v2330_v56 = vadd.s32 4294967169, %v461_v52  ;;  %v669_v60 = vshrl.u32 %v668_v57, 23  ;;  %v465_v61 = vor.u32 8388608, %v464_v53  ;;  %v569_v62 = vor.u32 8388608, %v568_v55 }
 0x151   : > { %v2334_v58 = vadd.s32 4294967169, %v565_v54 }
 0x152   : > { %v467_v59 = vadd.s32 1, %v2330_v56  ;;  %v2338_v1 = vadd.s32 4294967169, %v669_v60  ;;  %v2991_v6 = vshll.u32 %v465_v61, 8  ;;  %v2993_v7 = vshll.u32 %v569_v62, 8 }
 0x153   : > { %v571_v63 = vadd.s32 1, %v2334_v58 }
 0x154   : > { %vm468_vm2 = vcmp.gt.s32.totalorder %v467_v59, 0  ;;  %v2995_v9 = vadd.s32 1, %v2338_v1 }
 0x155   : > { %v469_v2 = vsel %vm468_vm2, %v467_v59, 0  ;;  %vm572_vm3 = vcmp.gt.s32.totalorder %v571_v63, 0 }
 0x156   : > { %v470_v3 = vshrl.u32 %v469_v2, 5  ;;  %v471_v4 = vand.u32 31, %v469_v2  ;;  %v573_v5 = vsel %vm572_vm3, %v571_v63, 0  ;;  %vm676_vm13 = vcmp.gt.s32.totalorder %v2995_v9, 0 }
 0x157   : > { %v2998_v14 = vshrl.u32 %v573_v5, 5  ;;  %v575_v15 = vand.u32 31, %v573_v5 }
 0x158   : > { %v472_v10 = vsub.s32 32, %v471_v4  ;;  %v474_v12 = vshll.u32 %v4678_v11, %v471_v4  ;;  %v477_v17 = vshll.u32 %v4674_v16, %v471_v4  ;;  %v480_v19 = vshll.u32 %v4672_v18, %v471_v4 }
 0x159   : > { %v483_v21 = vshll.u32 %v4670_v20, %v471_v4  ;;  %v486_v23 = vshll.u32 %v4682_v22, %v471_v4  ;;  %vm489_vm4 = vcmp.lt.s32.totalorder %v470_v3, 1  ;;  %vm490_vm5 = vcmp.lt.s32.totalorder %v470_v3, 2 }
 0x15a   : > { %v475_v24 = vshrl.u32 %v4674_v16, %v472_v10  ;;  %v478_v25 = vshrl.u32 %v4672_v18, %v472_v10  ;;  %v481_v26 = vshrl.u32 %v4670_v20, %v472_v10  ;;  %v473_v27 = vshrl.u32 %v4678_v11, %v472_v10 }
 0x15b   : > { %v484_v28 = vshrl.u32 %v4682_v22, %v472_v10  ;;  %v487_v30 = vshrl.u32 %v4680_v29, %v472_v10  ;;  %v576_v34 = vsub.s32 32, %v575_v15  ;;  %vm491_vm6 = vcmp.lt.s32.totalorder %v470_v3, 3 }
 0x15c   : > { %v476_v31 = vor.u32 %v475_v24, %v474_v12  ;;  %v479_v32 = vor.u32 %v478_v25, %v477_v17  ;;  %v482_v33 = vor.u32 %v481_v26, %v480_v19  ;;  %vm492_vm7 = vcmp.lt.s32.totalorder %v470_v3, 4 }
 0x15d   : > { %v485_v36 = vor.u32 %v484_v28, %v483_v21  ;;  %v488_v37 = vor.u32 %v487_v30, %v486_v23  ;;  %v578_v55 = vshll.u32 %v4678_v11, %v575_v15  ;;  %v579_v58 = vshrl.u32 %v4674_v16, %v576_v34 }
 0x15e   : > { %v493_v38 = vsel %vm489_vm4, %v473_v27, %v476_v31  ;;  %v494_v42 = vsel %vm492_vm7, %v482_v33, 2102212464  ;;  %v497_v49 = vsel %vm489_vm4, %v476_v31, %v479_v32  ;;  %v501_v51 = vsel %vm489_vm4, %v479_v32, %v482_v33 }
 0x15f   : > { %v495_v52 = vsel %vm491_vm6, %v479_v32, %v494_v42  ;;  %v498_v53 = vsel %vm492_vm7, %v485_v36, 920167782  ;;  %v502_v54 = vsel %vm492_vm7, %v488_v37, 1326507024  ;;  %v581_v59 = vshll.u32 %v4674_v16, %v575_v15 }
 0x160   : > { %v499_v56 = vsel %vm491_vm6, %v482_v33, %v498_v53  ;;  %v503_v57 = vsel %vm491_vm6, %v485_v36, %v502_v54  ;;  %v496_v60 = vsel %vm490_vm5, %v493_v38, %v495_v52  ;;  %v582_v63 = vshrl.u32 %v4672_v18, %v576_v34 }
 0x161   : > { %v500_v61 = vsel %vm490_vm5, %v497_v49, %v499_v56  ;;  %v504_v62 = vsel %vm490_vm5, %v501_v51, %v503_v57  ;;  %v580_v10 = vor.u32 %v579_v58, %v578_v55  ;;  %v584_v17 = vshll.u32 %v4672_v18, %v575_v15 }
 0x162   : > { %v3021_v1 = vmul.u32.u64.low %v2991_v6, %v504_v62  ;;  %v3022_v2 = vmul.u32.u64.high %v2991_v6, %v504_v62, %v3021_v1  ;;  %v3025_v4 = vmul.u32.u64.low %v2991_v6, %v500_v61  ;;  %v3026_v5 = vmul.u32.u64.high %v2991_v6, %v500_v61, %v3025_v4 }
 0x163   : > { %v583_v12 = vor.u32 %v582_v63, %v581_v59  ;;  %v585_v19 = vshrl.u32 %v4670_v20, %v576_v34  ;;  %v577_v3 = vshrl.u32 %v4678_v11, %v576_v34  ;;  %v587_v21 = vshll.u32 %v4670_v20, %v575_v15 }
 0x164   : > { %v588_v23 = vshrl.u32 %v4682_v22, %v576_v34  ;;  %v591_v24 = vshrl.u32 %v4680_v29, %v576_v34  ;;  %v512_v25 = vmul.u32 %v2991_v6, %v496_v60  ;;  %v590_v27 = vshll.u32 %v4682_v22, %v575_v15 }
 0x165   : > { %v586_v26 = vor.u32 %v585_v19, %v584_v17  ;;  %vm593_vm8 = vcmp.lt.s32.totalorder %v2998_v14, 1  ;;  %vm514_vm9 = vc.u32 %v3022_v2, %v3025_v4  ;;  %v515_v28 = vadd.s32 1, %v3026_v5 }
 0x166   : > { %v589_v30 = vor.u32 %v588_v23, %v587_v21  ;;  %vm594_vm10 = vcmp.lt.s32.totalorder %v2998_v14, 2  ;;  %v592_v31 = vor.u32 %v591_v24, %v590_v27  ;;  %vm595_vm11 = vcmp.lt.s32.totalorder %v2998_v14, 3 }
 0x167   : > { %vm596_vm12 = vcmp.lt.s32.totalorder %v2998_v14, 4  ;;  %v601_v32 = vsel %vm593_vm8, %v580_v10, %v583_v12  ;;  %v516_v6 = vsel %vm514_vm9, %v515_v28, %v3026_v5  ;;  %v605_v34 = vsel %vm593_vm8, %v583_v12, %v586_v26 }
 0x168   : > { %v598_v33 = vsel %vm596_vm12, %v586_v26, 2102212464  ;;  %v602_v15 = vsel %vm596_vm12, %v589_v30, 920167782  ;;  %v517_v36 = vadd.s32 %v516_v6, %v512_v25  ;;  %v597_v37 = vsel %vm593_vm8, %v577_v3, %v580_v10 }
 0x169   : > { %v603_v38 = vsel %vm595_vm11, %v586_v26, %v602_v15  ;;  %v606_v42 = vsel %vm596_vm12, %v592_v31, 1326507024  ;;  %v599_v49 = vsel %vm595_vm11, %v583_v12, %v598_v33  ;;  %v677_v59 = vsel %vm676_vm13, %v2995_v9, 0 }
 0x16a   : > { %v604_v51 = vsel %vm594_vm10, %v601_v32, %v603_v38  ;;  %v607_v52 = vsel %vm595_vm11, %v589_v30, %v606_v42  ;;  %v518_v53 = vadd.s32 536870912, %v517_v36  ;;  %v600_v61 = vsel %vm594_vm10, %v597_v37, %v599_v49 }
 0x16b   : > { %v608_v54 = vsel %vm594_vm10, %v605_v34, %v607_v52  ;;  %v3051_v55 = vmul.u32.u64.low %v2993_v7, %v604_v51  ;;  %v3052_v56 = vmul.u32.u64.high %v2993_v7, %v604_v51, %v3051_v55  ;;  %v679_v62 = vand.u32 31, %v677_v59 }
 0x16c   : > { %v3056_v57 = vmul.u32.u64.low %v2993_v7, %v608_v54  ;;  %v3057_v58 = vmul.u32.u64.high %v2993_v7, %v608_v54, %v3056_v57  ;;  %v3060_v60 = vshrl.u32 %v518_v53, 30  ;;  %v3066_v63 = vadd.f32 %v2973_v45, %v2966_v43 }
 0x16d   : > { %v619_v5 = vadd.s32 1, %v3052_v56  ;;  %v616_v10 = vmul.u32 %v2993_v7, %v600_v61  ;;  %v680_v9 = vsub.s32 32, %v679_v62  ;;  %v4669_v17 = vand.u32 2147483647, %v2981_v48 }
 0x16e   : > { %v520_v1 = vshll.u32 %v3060_v60, 30  ;;  %vm618_vm14 = vc.u32 %v3057_v58, %v3051_v55  ;;  %v772_v3 = vand.u32 2139095040, %v3066_v63  ;;  %v682_v25 = vshll.u32 %v4678_v11, %v679_v62 }
 0x16f   : > { %v620_v14 = vsel %vm618_vm14, %v619_v5, %v3052_v56  ;;  %v683_v23 = vshrl.u32 %v4674_v16, %v680_v9  ;;  %v686_v7 = vshrl.u32 %v4672_v18, %v680_v9  ;;  %v672_v24 = vand.u32 8388607, %v4669_v17 }
 0x170   : > { %v3073_v12 = vsub.s32 %v517_v36, %v520_v1  ;;  %v621_v19 = vadd.s32 %v620_v14, %v616_v10  ;;  %v692_v26 = vshrl.u32 %v4682_v22, %v680_v9  ;;  %v685_v30 = vshll.u32 %v4674_v16, %v679_v62 }
 0x171   : > { %v689_v31 = vshrl.u32 %v4670_v20, %v680_v9  ;;  %v678_v32 = vshrl.u32 %v677_v59, 5  ;;  %v691_v6 = vshll.u32 %v4670_v20, %v679_v62  ;;  %v695_v33 = vshrl.u32 %v4680_v29, %v680_v9 }
 0x172   : > { %v523_v45 = vsub.s32 0, %v3073_v12  ;;  %v622_v21 = vadd.s32 536870912, %v621_v19  ;;  %v773_v15 = vshrl.u32 %v772_v3, 23  ;;  %v684_v36 = vor.u32 %v683_v23, %v682_v25 }
 0x173   : > { %v687_v37 = vor.u32 %v686_v7, %v685_v30  ;;  %v688_v38 = vshll.u32 %v4672_v18, %v679_v62  ;;  %v298_v42 = vcombine.high %v2952_v35, %v2952_v35  ;;  %v693_v49 = vor.u32 %v692_v26, %v691_v6 }
 0x174   : > { %v2331_v27 = vmin.u32 %v523_v45, %v3073_v12  ;;  %v3086_v28 = vshrl.u32 %v622_v21, 30  ;;  %v694_v51 = vshll.u32 %v4682_v22, %v679_v62  ;;  %v673_v56 = vor.u32 8388608, %v672_v24 }
 0x175   : > { %v690_v54 = vor.u32 %v689_v31, %v688_v38  ;;  %vm697_vm15 = vcmp.lt.s32.totalorder %v678_v32, 1  ;;  %vm700_vm0 = vcmp.lt.s32.totalorder %v678_v32, 4  ;;  %v2342_v1 = vadd.s32 4294967169, %v773_v15 }
 0x176   : > { %v624_v34 = vshll.u32 %v3086_v28, 30  ;;  %v525_v52 = vclz %v2331_v27  ;;  %v696_v57 = vor.u32 %v695_v33, %v694_v51  ;;  %v705_v61 = vsel %vm697_vm15, %v684_v36, %v687_v37 }
 0x177   : > { %v312_v5 = vrot.slane %v298_v42, %v2934_v8  ;;  %v681_v35 = vshrl.u32 %v4678_v11, %v680_v9  ;;  %vm699_vm1 = vcmp.lt.s32.totalorder %v678_v32, 3  ;;  %v706_v10 = vsel %vm700_vm0, %v693_v49, 920167782 }
 0x178   : > { %v3097_v53 = vsub.s32 %v621_v19, %v624_v34  ;;  %v2332_v62 = vadd.s32 4294967294, %v525_v52  ;;  %vm698_vm2 = vcmp.lt.s32.totalorder %v678_v32, 2  ;;  %v702_v14 = vsel %vm700_vm0, %v690_v54, 2102212464 }
 0x179   : > { %v707_v19 = vsel %vm699_vm1, %v690_v54, %v706_v10  ;;  %v709_v21 = vsel %vm697_vm15, %v687_v37, %v690_v54  ;;  %v710_v23 = vsel %vm700_vm0, %v696_v57, 1326507024  ;;  %v713_v7 = vshll.u32 %v673_v56, 8 }
 0x17a   : > { %v627_v59 = vsub.s32 0, %v3097_v53  ;;  %v708_v3 = vsel %vm698_vm2, %v705_v61, %v707_v19  ;;  %v779_v24 = vadd.s32 1, %v2342_v1  ;;  %v701_v25 = vsel %vm697_vm15, %v681_v35, %v684_v36 }
 0x17b   : > { %v703_v26 = vsel %vm699_vm1, %v687_v37, %v702_v14  ;;  %v711_v27 = vsel %vm699_vm1, %v693_v49, %v710_v23  ;;  %vm2333_vm3 = vcmp.lt.s32.totalorder %v2332_v62, 0  ;;  %v314_v6 = vcombine.high %v312_v5, %v312_v5 }
 0x17c   : > { %v2335_v45 = vmin.u32 %v627_v59, %v3097_v53  ;;  %v712_v9 = vsel %vm698_vm2, %v709_v21, %v711_v27  ;;  %v3108_v30 = vmul.u32.u64.low %v713_v7, %v708_v3  ;;  %v3109_v31 = vmul.u32.u64.high %v713_v7, %v708_v3, %v3108_v30 }
 0x17d   : > { %v3112_v15 = vmul.u32.u64.low %v713_v7, %v712_v9  ;;  %v3113_v34 = vmul.u32.u64.high %v713_v7, %v712_v9, %v3112_v15  ;;  %v704_v38 = vsel %vm698_vm2, %v701_v25, %v703_v26  ;;  %vm780_vm4 = vcmp.gt.s32.totalorder %v779_v24, 0 }
 0x17e   : > { %v629_v33 = vclz %v2335_v45  ;;  %v328_v42 = vrot.slane %v312_v5, %v2934_v8  ;;  %v3117_v36 = vsel %vm2333_vm3, 0, %v2332_v62  ;;  %v781_v37 = vsel %vm780_vm4, %v779_v24, 0 }
 0x17f   : > { %v343_v49 = vcombine.high %v2957_v39, %v2957_v39  ;;  %v723_v51 = vadd.s32 1, %v3109_v31  ;;  %v4668_v52 = vand.u32 2147483647, %v3066_v63  ;;  %v3124_v54 = vrot.slane %v314_v6, %v2934_v8 }
 0x180   : > { %v2336_v56 = vadd.s32 4294967294, %v629_v33  ;;  %v720_v57 = vmul.u32 %v713_v7, %v704_v38  ;;  %vm722_vm5 = vc.u32 %v3113_v34, %v3108_v30  ;;  %v345_v32 = vcombine.high %v2960_v40, %v2960_v40 }
 0x181   : > { %v533_v59 = vsub.s32 4294967266, %v3117_v36  ;;  %v724_v61 = vsel %vm722_vm5, %v723_v51, %v3109_v31  ;;  %v783_v39 = vand.u32 31, %v781_v37  ;;  %v344_v1 = vcombine.high %v328_v42, %v328_v42 }
 0x182   : > { %v3133_v5 = vand.u32 127, %v302_v0  ;;  %v725_v35 = vadd.s32 %v724_v61, %v720_v57  ;;  %v3136_v8 = vrot.slane %v343_v49, %v2936_v13  ;;  %v529_v10 = vsub.s32 32, %v3117_v36 }
 0x183   : > { %v776_v62 = vand.u32 8388607, %v4668_v52  ;;  %v784_v14 = vsub.s32 32, %v783_v39  ;;  %v346_v40 = vcombine.high %v3124_v54, %v3124_v54  ;;  %v3144_v19 = vrot.slane %v328_v42, %v2936_v13 }
 0x184   : > { %4694 = vst [vmem:[#allocation9_spill] sm:$0xff] %v3133_v5  ;;  %vm2337_vm6 = vcmp.lt.s32.totalorder %v2336_v56, 0  ;;  %v726_v45 = vadd.s32 536870912, %v725_v35  ;;  %v3147_v0 = vrot.slane %v345_v32, %v2936_v13  ;;  %v3151_v3 = vrot.slane %v3124_v54, %v2936_v13 }
 0x185   : > { %v513_v21 = vadd.s32 %v3025_v4, %v3022_v2  ;;  %v534_v23 = vadd.s32 127, %v533_v59  ;;  %v3156_v7 = vrot.slane %v344_v1, %v2936_v13  ;;  %v787_v25 = vshrl.u32 %v4674_v16, %v784_v14 }
 0x186   : > { %v3158_v24 = vshrl.u32 %v726_v45, 30  ;;  %v790_v26 = vshrl.u32 %v4672_v18, %v784_v14  ;;  %v3162_v9 = vsel %vm2337_vm6, 0, %v2336_v56  ;;  %v777_v31 = vor.u32 8388608, %v776_v62 }
 0x187   : > { %v531_v27 = vshrl.u32 %v513_v21, %v529_v10  ;;  %v793_v6 = vshrl.u32 %v4670_v20, %v784_v14  ;;  %v782_v15 = vshrl.u32 %v781_v37, 5  ;;  %v786_v2 = vshll.u32 %v4678_v11, %v783_v39 }
 0x188   : > { %v728_v33 = vshll.u32 %v3158_v24, 30  ;;  %v789_v4 = vshll.u32 %v4674_v16, %v783_v39  ;;  %v535_v38 = vshll.u32 %v534_v23, 23  ;;  %v792_v42 = vshll.u32 %v4672_v18, %v783_v39 }
 0x189   : > { %v795_v49 = vshll.u32 %v4670_v20, %v783_v39  ;;  %v796_v51 = vshrl.u32 %v4682_v22, %v784_v14  ;;  %v637_v56 = vsub.s32 4294967266, %v3162_v9  ;;  %v788_v57 = vor.u32 %v787_v25, %v786_v2 }
 0x18a   : > { %v791_v32 = vor.u32 %v790_v26, %v789_v4  ;;  %v799_v59 = vshrl.u32 %v4680_v29, %v784_v14  ;;  %v3173_v61 = vsub.s32 %v725_v35, %v728_v33  ;;  %v794_v37 = vor.u32 %v793_v6, %v792_v42 }
 0x18b   : > { %v797_v1 = vor.u32 %v796_v51, %v795_v49  ;;  %v798_v10 = vshll.u32 %v4682_v22, %v783_v39  ;;  %v3178_v62 = vadd.f32 %v3136_v8, %v2962_v41  ;;  %v530_v45 = vshll.u32 %v3073_v12, %v3117_v36 }
 0x18c   : > { %vm804_vm7 = vcmp.lt.s32.totalorder %v782_v15, 4  ;;  %v817_v21 = vshll.u32 %v777_v31, 8  ;;  %v536_v23 = vor.u32 4788187, %v535_v38  ;;  %vm801_vm8 = vcmp.lt.s32.totalorder %v782_v15, 1 }
 0x18d   : > { %v800_v25 = vor.u32 %v799_v59, %v798_v10  ;;  %v810_v26 = vsel %vm804_vm7, %v797_v1, 920167782  ;;  %v617_v35 = vadd.s32 %v3051_v55, %v3057_v58  ;;  %v638_v6 = vadd.s32 127, %v637_v56 }
 0x18e   : > { %vm803_vm9 = vcmp.lt.s32.totalorder %v782_v15, 3  ;;  %v809_v39 = vsel %vm801_vm8, %v788_v57, %v791_v32  ;;  %v532_v33 = vor.u32 %v531_v27, %v530_v45  ;;  %v731_v2 = vsub.s32 0, %v3173_v61 }
 0x18f   : > { %v806_v4 = vsel %vm804_vm7, %v794_v37, 2102212464  ;;  %v811_v12 = vsel %vm803_vm9, %v794_v37, %v810_v26  ;;  %v633_v36 = vsub.s32 32, %v3162_v9  ;;  %v785_v31 = vshrl.u32 %v4678_v11, %v784_v14 }
 0x190   : > { %vm802_vm10 = vcmp.lt.s32.totalorder %v782_v15, 2  ;;  %v813_v38 = vsel %vm801_vm8, %v791_v32, %v794_v37  ;;  %v537_v42 = vand.u32 2147483647, %v536_v23  ;;  %v814_v58 = vsel %vm804_vm7, %v800_v25, 1326507024 }
 0x191   : > { %v812_v55 = vsel %vm802_vm10, %v809_v39, %v811_v12  ;;  %v876_v27 = vand.u32 2139095040, %v3178_v62  ;;  %v639_v49 = vshll.u32 %v638_v6, 23  ;;  %v805_v51 = vsel %vm801_vm8, %v785_v31, %v788_v57 }
 0x192   : > { %v807_v56 = vsel %vm803_vm9, %v791_v32, %v806_v4  ;;  %v815_v59 = vsel %vm803_vm9, %v797_v1, %v814_v58  ;;  %v2339_v10 = vmin.u32 %v731_v2, %v3173_v61  ;;  %v3206_v23 = vadd.f32 %v3136_v8, %v2966_v43 }
 0x193   : > { %v816_v14 = vsel %vm802_vm10, %v813_v38, %v815_v59  ;;  %v3200_v45 = vmul.u32.u64.low %v817_v21, %v812_v55  ;;  %v3201_v37 = vmul.u32.u64.high %v817_v21, %v812_v55, %v3200_v45  ;;  %v635_v25 = vshrl.u32 %v617_v35, %v633_v36 }
 0x194   : > { %v3208_v26 = vmul.u32.u64.low %v817_v21, %v816_v14  ;;  %v3209_v6 = vmul.u32.u64.high %v817_v21, %v816_v14, %v3208_v26  ;;  %v3215_v57 = vrot.slane %v346_v40, %v2936_v13  ;;  %v539_v32 = vcvt.s32.f32 %v532_v33 }
 0x195   : > { %v808_v1 = vsel %vm802_vm10, %v805_v51, %v807_v56  ;;  %v877_v39 = vshrl.u32 %v876_v27, 23  ;;  %v3220_v2 = vadd.f32 %v3147_v0, %v2962_v41  ;;  %v543_v8 = vsub.s32 4, %v3060_v60 }
 0x196   : > { %v634_v35 = vshll.u32 %v3097_v53, %v3162_v9  ;;  %v640_v4 = vor.u32 4788187, %v639_v49  ;;  %v540_v12 = vmul.f32 %v539_v32, %v537_v42  ;;  %v733_v36 = vclz %v2339_v10 }
 0x197   : > { %v827_v54 = vadd.s32 1, %v3201_v37  ;;  %v2346_v13 = vadd.s32 4294967169, %v877_v39  ;;  %v3228_v40 = vadd.f32 %v3147_v0, %v2966_v43  ;;  %v824_v33 = vmul.u32 %v817_v21, %v808_v1 }
 0x198   : > { %v636_v15 = vor.u32 %v635_v25, %v634_v35  ;;  %vm826_vm11 = vc.u32 %v3209_v6, %v3200_v45  ;;  %vm459_vm12 = vcmp.lt.s32.totalorder %v2969_v44, 0  ;;  %v4667_v53 = vand.u32 2147483647, %v3178_v62 }
 0x199   : > { %v828_v31 = vsel %vm826_vm11, %v827_v54, %v3201_v37  ;;  %v883_v9 = vadd.s32 1, %v2346_v13  ;;  %v544_v38 = vsel %vm459_vm12, %v543_v8, %v3060_v60  ;;  %v641_v42 = vand.u32 2147483647, %v640_v4 }
 0x19a   : > { %v647_v0 = vsub.s32 4, %v3086_v28  ;;  %v829_v55 = vadd.s32 %v828_v31, %v824_v33  ;;  %v3241_v21 = vadd.f32 %v3144_v19, %v2962_v41  ;;  %v541_v58 = vxor.u32 2147483648, %v540_v12 }
 0x19b   : > { %v2340_v27 = vadd.s32 4294967294, %v733_v36  ;;  %vm884_vm13 = vcmp.gt.s32.totalorder %v883_v9, 0  ;;  %v3245_v49 = vadd.f32 %v3144_v19, %v2966_v43  ;;  %vm3249_vm14 = vcmp.le.f32.partialorder %v457_v47, 0.7853982 }
 0x19c   : > { %v643_v60 = vcvt.s32.f32 %v636_v15  ;;  %v830_v56 = vadd.s32 536870912, %v829_v55  ;;  %v3255_v59 = vadd.f32 %v3151_v3, %v2962_v41  ;;  %v546_v10 = vsel %vm3249_vm14, 0, %v544_v38 }
 0x19d   : > { %vm563_vm15 = vcmp.lt.s32.totalorder %v2976_v46, 0  ;;  %v885_v14 = vsel %vm884_vm13, %v883_v9, 0  ;;  %v880_v25 = vand.u32 8388607, %v4667_v53  ;;  %v542_v26 = vsel %vm459_vm12, %v541_v58, %v540_v12 }
 0x19e   : > { %v644_v19 = vmul.f32 %v643_v60, %v641_v42  ;;  %v3263_v47 = vsel %vm563_vm15, %v647_v0, %v3086_v28  ;;  %v3265_v37 = vshrl.u32 %v830_v56, 30  ;;  %vm2341_vm0 = vcmp.lt.s32.totalorder %v2340_v27, 0 }
 0x19f   : > { %v887_v32 = vand.u32 31, %v885_v14  ;;  %v980_v1 = vand.u32 2139095040, %v3206_v23  ;;  %v3274_v39 = vadd.f32 %v3151_v3, %v2966_v43  ;;  %v3278_v28 = vadd.f32 %v3156_v7, %v2962_v41 }
 0x1a0   : > { %vm3282_vm1 = vcmp.le.f32.partialorder %v561_v50, 0.7853982  ;;  %v832_v35 = vshll.u32 %v3265_v37, 30  ;;  %v3289_v4 = vadd.f32 %v3156_v7, %v2966_v43  ;;  %v550_v12 = vadd.s32 3, %v546_v10 }
 0x1a1   : > { %v650_v3 = vsel %vm3282_vm1, 0, %v3263_v47  ;;  %v888_v36 = vsub.s32 32, %v887_v32  ;;  %v3297_v54 = vsel %vm3249_vm14, %v2969_v44, %v542_v26  ;;  %v645_v50 = vxor.u32 2147483648, %v644_v19 }
 0x1a2   : > { %v3299_v13 = vsel %vm2341_vm0, 0, %v2340_v27  ;;  %v3301_v15 = vsub.s32 %v829_v55, %v832_v35  ;;  %v881_v33 = vor.u32 8388608, %v880_v25  ;;  %v981_v9 = vshrl.u32 %v980_v1, 23 }
 0x1a3   : > { %v891_v7 = vshrl.u32 %v4674_v16, %v888_v36  ;;  %v894_v31 = vshrl.u32 %v4672_v18, %v888_v36  ;;  %v890_v42 = vshll.u32 %v4678_v11, %v887_v32  ;;  %v893_v0 = vshll.u32 %v4674_v16, %v887_v32 }
 0x1a4   : > { %v835_v38 = vsub.s32 0, %v3301_v15  ;;  %v897_v58 = vshrl.u32 %v4670_v20, %v888_v36  ;;  %v886_v51 = vshrl.u32 %v885_v14, 5  ;;  %v896_v27 = vshll.u32 %v4672_v18, %v887_v32 }
 0x1a5   : > { %v899_v55 = vshll.u32 %v4670_v20, %v887_v32  ;;  %v900_v60 = vshrl.u32 %v4682_v22, %v888_v36  ;;  %v646_v56 = vsel %vm563_vm15, %v645_v50, %v644_v19  ;;  %v892_v47 = vor.u32 %v891_v7, %v890_v42 }
 0x1a6   : > { %v2343_v10 = vmin.u32 %v835_v38, %v3301_v15  ;;  %v895_v25 = vor.u32 %v894_v31, %v893_v0  ;;  %v898_v26 = vor.u32 %v897_v58, %v896_v27  ;;  %v902_v35 = vshll.u32 %v4682_v22, %v887_v32 }
 0x1a7   : > { %v901_v1 = vor.u32 %v900_v60, %v899_v55  ;;  %v903_v53 = vshrl.u32 %v4680_v29, %v888_v36  ;;  %v737_v14 = vsub.s32 32, %v3299_v13  ;;  %v741_v52 = vsub.s32 4294967266, %v3299_v13 }
 0x1a8   : > { %v837_v17 = vclz %v2343_v10  ;;  %v921_v20 = vshll.u32 %v881_v33, 8  ;;  %v889_v18 = vshrl.u32 %v4678_v11, %v888_v36  ;;  %vm905_vm2 = vcmp.lt.s32.totalorder %v886_v51, 1 }
 0x1a9   : > { %v904_v16 = vor.u32 %v903_v53, %v902_v35  ;;  %v2350_v19 = vadd.s32 4294967169, %v981_v9  ;;  %vm907_vm3 = vcmp.lt.s32.totalorder %v886_v51, 3  ;;  %vm908_vm4 = vcmp.lt.s32.totalorder %v886_v51, 4 }
 0x1aa   : > { %v2344_v50 = vadd.s32 4294967294, %v837_v17  ;;  %v913_v7 = vsel %vm905_vm2, %v892_v47, %v895_v25  ;;  %v910_v31 = vsel %vm908_vm4, %v898_v26, 2102212464  ;;  %v914_v32 = vsel %vm908_vm4, %v901_v1, 920167782 }
 0x1ab   : > { %v917_v38 = vsel %vm905_vm2, %v895_v25, %v898_v26  ;;  %v918_v42 = vsel %vm908_vm4, %v904_v16, 1326507024  ;;  %vm906_vm6 = vcmp.lt.s32.totalorder %v886_v51, 2  ;;  %v915_v0 = vsel %vm907_vm3, %v898_v26, %v914_v32 }
 0x1ac   : > { %vm2345_vm5 = vcmp.lt.s32.totalorder %v2344_v50, 0  ;;  %v919_v33 = vsel %vm907_vm3, %v901_v1, %v918_v42  ;;  %v742_v36 = vadd.s32 127, %v741_v52  ;;  %v916_v17 = vsel %vm906_vm6, %v913_v7, %v915_v0 }
 0x1ad   : > { %v3324_v53 = vsel %vm2345_vm5, 0, %v2344_v50  ;;  %v920_v9 = vsel %vm906_vm6, %v917_v38, %v919_v33  ;;  %v909_v27 = vsel %vm905_vm2, %v889_v18, %v892_v47  ;;  %v911_v55 = vsel %vm907_vm3, %v895_v25, %v910_v31 }
 0x1ae   : > { %v845_v58 = vsub.s32 4294967266, %v3324_v53  ;;  %v987_v16 = vadd.s32 1, %v2350_v19  ;;  %v3331_v60 = vmul.u32.u64.low %v921_v20, %v920_v9  ;;  %v3332_v10 = vmul.u32.u64.high %v921_v20, %v920_v9, %v3331_v60 }
 0x1af   : > { %v3334_v26 = vmul.u32.u64.low %v921_v20, %v916_v17  ;;  %v3335_v35 = vmul.u32.u64.high %v921_v20, %v916_v17, %v3334_v26  ;;  %v3340_v52 = vadd.f32 %v3215_v57, %v2962_v41  ;;  %v3344_v1 = vadd.f32 %v3215_v57, %v2966_v43 }
 0x1b0   : > { %v721_v18 = vadd.s32 %v3108_v30, %v3113_v34  ;;  %vm988_vm7 = vcmp.gt.s32.totalorder %v987_v16, 0  ;;  %v3348_v47 = vand.u32 3, %v550_v12  ;;  %v3350_v25 = vadd.s32 3, %v650_v3 }
 0x1b1   : > { %4699 = vst [vmem:[#allocation10_spill] sm:$0xff] %v3344_v1  ;;  %v912_v19 = vsel %vm906_vm6, %v909_v27, %v911_v55  ;;  %v989_v50 = vsel %vm988_vm7, %v987_v16, 0  ;;  %2550 = vcosq.f32 %v3297_v54  ;;  %v649_v41 = vsel %vm3282_vm1, %v2976_v46, %v646_v56 }
 0x1b2   : > { %v739_v7 = vshrl.u32 %v721_v18, %v737_v14  ;;  %v743_v43 = vshll.u32 %v742_v36, 23  ;;  %v846_v57 = vadd.s32 127, %v845_v58  ;;  %vm930_vm8 = vc.u32 %v3332_v10, %v3334_v26 }
 0x1b3   : > { %v931_v30 = vadd.s32 1, %v3335_v35  ;;  %v4677_v34 = vand.u32 2147483647, %v3206_v23  ;;  %2552 = vsinq.f32 %v3297_v54  ;;  %v738_v12 = vshll.u32 %v3173_v61, %v3299_v13 }
 0x1b4   : > { %v928_v3 = vmul.u32 %v921_v20, %v912_v19  ;;  %v991_v51 = vand.u32 31, %v989_v50  ;;  %2554 = vcosq.f32 %v649_v41  ;;  %v751_v8 = vsub.s32 4, %v3158_v24 }
 0x1b5   : > { %v825_v56 = vadd.s32 %v3200_v45, %v3209_v6  ;;  %v932_v14 = vsel %vm930_vm8, %v931_v30, %v3335_v35  ;;  %v740_v31 = vor.u32 %v739_v7, %v738_v12  ;;  %v744_v32 = vor.u32 4788187, %v743_v43 }
 0x1b6   : > { %v933_v38 = vadd.s32 %v932_v14, %v928_v3  ;;  %v992_v42 = vsub.s32 32, %v991_v51  ;;  %v841_v0 = vsub.s32 32, %v3324_v53  ;;  %v847_v54 = vshll.u32 %v846_v57, 23 }
 0x1b7   : > { %v984_v61 = vand.u32 8388607, %v4677_v34  ;;  %v3371_v20 = vshrl.u32 %v989_v50, 5  ;;  %v994_v33 = vshll.u32 %v4678_v11, %v991_v51  ;;  %v4700_v36 = vmov 2475754826  }
 0x1b8   : > { %v934_v13 = vadd.s32 536870912, %v933_v38  ;;  %v995_v17 = vshrl.u32 %v4700_v36, %v992_v42  ;;  %v997_v45 = vshll.u32 %v4700_v36, %v991_v51  ;;  %v4701_v6 = vmov 2131351028  }
 0x1b9   : > { %v998_v9 = vshrl.u32 %v4701_v6, %v992_v42  ;;  %v4702_v58 = vmov 2102212464   ;;  %v1004_v16 = vshrl.u32 %v4682_v22, %v992_v42  ;;  %v1000_v18 = vshll.u32 %v4701_v6, %v991_v51 }
 0x1ba   : > { %v1001_v27 = vshrl.u32 %v4702_v58, %v992_v42  ;;  %v1003_v55 = vshll.u32 %v4702_v58, %v991_v51  ;;  %v3380_v60 = vshrl.u32 %v934_v13, 30  ;;  %v996_v35 = vor.u32 %v995_v17, %v994_v33 }
 0x1bb   : > { %v1007_v19 = vshrl.u32 %v4680_v29, %v992_v42  ;;  %v985_v50 = vor.u32 8388608, %v984_v61  ;;  %v999_v7 = vor.u32 %v998_v9, %v997_v45  ;;  %v1006_v57 = vshll.u32 %v4682_v22, %v991_v51  ;;  %v3385_v30 = vpop.eup %2550 }
 0x1bc   : > { %v1005_v43 = vor.u32 %v1004_v16, %v1003_v55  ;;  %2556 = vsinq.f32 %v649_v41  ;;  %v843_v12 = vshrl.u32 %v825_v56, %v841_v0  ;;  %v936_v3 = vshll.u32 %v3380_v60, 30 }
 0x1bd   : > { %v1002_v14 = vor.u32 %v1001_v27, %v1000_v18  ;;  %vm667_vm9 = vcmp.lt.s32.totalorder %v2981_v48, 0  ;;  %v747_v13 = vcvt.s32.f32 %v740_v31  ;;  %v842_v33 = vshll.u32 %v3301_v15, %v3324_v53  ;;  %v3392_v61 = vpop.eup %2552 }
 0x1be   : > { %v1008_v17 = vor.u32 %v1007_v19, %v1006_v57  ;;  %vm1009_vm10 = vcmp.lt.s32.totalorder %v3371_v20, 1  ;;  %v848_v45 = vor.u32 4788187, %v847_v54  ;;  %v3394_v51 = vsub.s32 %v933_v38, %v936_v3  ;;  %v3399_v56 = vpop.eup %2554 }
 0x1bf   : > { %vm1012_vm11 = vcmp.lt.s32.totalorder %v3371_v20, 4  ;;  %v1017_v41 = vsel %vm1009_vm10, %v996_v35, %v999_v7  ;;  %v745_v0 = vand.u32 2147483647, %v744_v32  ;;  %vm1011_vm12 = vcmp.lt.s32.totalorder %v3371_v20, 3 }
 0x1c0   : > { %v1018_v31 = vsel %vm1012_vm11, %v1005_v43, 920167782  ;;  %v1025_v15 = vshll.u32 %v985_v50, 8  ;;  %v844_v53 = vor.u32 %v843_v12, %v842_v33  ;;  %v939_v9 = vsub.s32 0, %v3394_v51 }
 0x1c1   : > { %vm1010_vm13 = vcmp.lt.s32.totalorder %v3371_v20, 2  ;;  %v1019_v38 = vsel %vm1011_vm12, %v1002_v14, %v1018_v31  ;;  %v1014_v54 = vsel %vm1012_vm11, %v1002_v14, 2102212464  ;;  %v1021_v55 = vsel %vm1009_vm10, %v999_v7, %v1002_v14 }
 0x1c2   : > { %v1020_v27 = vsel %vm1010_vm13, %v1017_v41, %v1019_v38  ;;  %v1022_v32 = vsel %vm1012_vm11, %v1008_v17, 1326507024  ;;  %v849_v16 = vand.u32 2147483647, %v848_v45  ;;  %v2347_v18 = vmin.u32 %v939_v9, %v3394_v51 }
 0x1c3   : > { %v993_v19 = vshrl.u32 %v4678_v11, %v992_v42  ;;  %v1023_v50 = vsel %vm1011_vm12, %v1005_v43, %v1022_v32  ;;  %v748_v57 = vmul.f32 %v747_v13, %v745_v0  ;;  %v851_v41 = vcvt.s32.f32 %v844_v53 }
 0x1c4   : > { %v1024_v12 = vsel %vm1010_vm13, %v1021_v55, %v1023_v50  ;;  %v3416_v3 = vmul.u32.u64.low %v1025_v15, %v1020_v27  ;;  %v3417_v33 = vmul.u32.u64.high %v1025_v15, %v1020_v27, %v3416_v3  ;;  %v941_v31 = vclz %v2347_v18 }
 0x1c5   : > { %v1013_v14 = vsel %vm1009_vm10, %v993_v19, %v996_v35  ;;  %v1015_v17 = vsel %vm1011_vm12, %v999_v7, %v1014_v54  ;;  %v655_v42 = vand.u32 3, %v3350_v25  ;;  %v1084_v13 = vand.u32 2139095040, %v3220_v2 }
 0x1c6   : > { %v3425_v45 = vmul.u32.u64.low %v1025_v15, %v1024_v12  ;;  %v3426_v43 = vmul.u32.u64.high %v1025_v15, %v1024_v12, %v3425_v45  ;;  %v2557_v0 = vpop.eup %2556  ;;  %v4703_v9 = vand.u32 2147483647, %v2981_v48  ;;  %v752_v35 = vsel %vm667_vm9, %v751_v8, %v3158_v24 }
 0x1c7   : > { %vm771_vm15 = vcmp.lt.s32.totalorder %v3066_v63, 0  ;;  %v852_v25 = vmul.f32 %v851_v41, %v849_v16  ;;  %v2348_v7 = vadd.s32 4294967294, %v941_v31  ;;  %v1016_v53 = vsel %vm1010_vm13, %v1013_v14, %v1015_v17 }
 0x1c8   : > { %vm3431_vm14 = vcmp.le.f32.partialorder %v4703_v9, 0.7853982  ;;  %v1035_v54 = vadd.s32 1, %v3417_v33  ;;  %v1085_v27 = vshrl.u32 %v1084_v13, 23  ;;  %vm553_vm0 = vcmp.eq.s32.totalorder %v3348_v47, 0 }
 0x1c9   : > { %vm556_vm1 = vcmp.eq.s32.totalorder %v3348_v47, 2  ;;  %v749_v55 = vxor.u32 2147483648, %v748_v57  ;;  %v4706_v32 = vand.u32 2147483647, %v3066_v63  ;;  %vm552_vm3 = vcmp.lt.s32.totalorder %v3348_v47, 2 }
 0x1ca   : > { %v554_v24 = vxor.u32 2147483648, %v3392_v61  ;;  %v557_v8 = vxor.u32 2147483648, %v3385_v30  ;;  %vm656_vm4 = vcmp.lt.s32.totalorder %v655_v42, 2  ;;  %v754_v20 = vsel %vm3431_vm14, 0, %v752_v35 }
 0x1cb   : > { %vm3448_vm2 = vcmp.le.f32.partialorder %v4706_v32, 0.7853982  ;;  %vm1034_vm5 = vc.u32 %v3426_v43, %v3416_v3  ;;  %vm657_vm6 = vcmp.eq.s32.totalorder %v655_v42, 0  ;;  %v661_v16 = vxor.u32 2147483648, %v3399_v56 }
 0x1cc   : > { %v853_v19 = vxor.u32 2147483648, %v852_v25  ;;  %v1032_v50 = vmul.u32 %v1025_v15, %v1016_v53  ;;  %v658_v12 = vxor.u32 2147483648, %v2557_v0  ;;  %vm2349_vm7 = vcmp.lt.s32.totalorder %v2348_v7, 0 }
 0x1cd   : > { %v1036_v41 = vsel %vm1034_vm5, %v1035_v54, %v3417_v33  ;;  %v2354_v31 = vadd.s32 4294967169, %v1085_v27  ;;  %v750_v14 = vsel %vm667_vm9, %v749_v55, %v748_v57  ;;  %v758_v17 = vadd.s32 3, %v754_v20 }
 0x1ce   : > { %v855_v45 = vsub.s32 4, %v3265_v37  ;;  %v1037_v13 = vadd.s32 %v1036_v41, %v1032_v50  ;;  %v555_v9 = vsel %vm553_vm0, %v3385_v30, %v554_v24  ;;  %v558_v15 = vsel %vm556_vm1, %v557_v8, %v3392_v61 }
 0x1cf   : > { %vm660_vm8 = vcmp.eq.s32.totalorder %v655_v42, 2  ;;  %v1091_v35 = vadd.s32 1, %v2354_v31  ;;  %v854_v33 = vsel %vm771_vm15, %v853_v19, %v852_v25  ;;  %v3472_v54 = vsel %vm2349_vm7, 0, %v2348_v7 }
 0x1d0   : > { %v662_v53 = vsel %vm660_vm8, %v661_v16, %v2557_v0  ;;  %v1038_v57 = vadd.s32 536870912, %v1037_v13  ;;  %v659_v27 = vsel %vm657_vm6, %v3399_v56, %v658_v12  ;;  %v753_v30 = vsel %vm3431_vm14, %v2981_v48, %v750_v14 }
 0x1d1   : > { %vm1092_vm9 = vcmp.gt.s32.totalorder %v1091_v35, 0  ;;  %v1188_v55 = vand.u32 2139095040, %v3228_v40  ;;  %v3480_v61 = vand.u32 3, %v758_v17  ;;  %v3485_v0 = vsel %vm771_vm15, %v855_v45, %v3265_v37 }
 0x1d2   : > { %v3487_v25 = vshrl.u32 %v1038_v57, 30  ;;  %v1093_v7 = vsel %vm1092_vm9, %v1091_v35, 0  ;;  %v3492_v56 = vsel %vm3448_vm2, %v3066_v63, %v854_v33  ;;  %vm875_vm10 = vcmp.lt.s32.totalorder %v3178_v62, 0 }
 0x1d3   : > { %v949_v38 = vsub.s32 4294967266, %v3472_v54  ;;  %v4676_v32 = vand.u32 2147483647, %v3220_v2  ;;  %v1095_v24 = vand.u32 31, %v1093_v7  ;;  %v3499_v8 = vsel %vm552_vm3, %v555_v9, %v558_v15 }
 0x1d4   : > { %v3502_v37 = vsel %vm656_vm4, %v659_v27, %v662_v53  ;;  %2558 = vcosq.f32 %v753_v30  ;;  %v1040_v20 = vshll.u32 %v3487_v25, 30  ;;  %v1189_v50 = vshrl.u32 %v1188_v55, 23 }
 0x1d5   : > { %2560 = vsinq.f32 %v753_v30  ;;  %v1096_v19 = vsub.s32 32, %v1095_v24  ;;  %v929_v47 = vadd.s32 %v3334_v26, %v3332_v10  ;;  %v959_v12 = vsub.s32 4, %v3380_v60 }
 0x1d6   : > { %2562 = vcosq.f32 %v3492_v56  ;;  %v3512_v42 = vsub.s32 %v1037_v13, %v1040_v20  ;;  %v950_v41 = vadd.s32 127, %v949_v38  ;;  %v1088_v31 = vand.u32 8388607, %v4676_v32 }
 0x1d7   : > { %v1099_v14 = vshrl.u32 %v4700_v36, %v1096_v19  ;;  %v1102_v17 = vshrl.u32 %v4701_v6, %v1096_v19  ;;  %v1098_v9 = vshll.u32 %v4678_v11, %v1095_v24  ;;  %v1101_v15 = vshll.u32 %v4700_v36, %v1095_v24 }
 0x1d8   : > { %v1043_v45 = vsub.s32 0, %v3512_v42  ;;  %v1105_v10 = vshrl.u32 %v4702_v58, %v1096_v19  ;;  %v1104_v26 = vshll.u32 %v4701_v6, %v1095_v24  ;;  %v1107_v13 = vshll.u32 %v4702_v58, %v1095_v24 }
 0x1d9   : > { %v1108_v35 = vshrl.u32 %v4682_v22, %v1096_v19  ;;  %v2358_v53 = vadd.s32 4294967169, %v1189_v50  ;;  %v1094_v57 = vshrl.u32 %v1093_v7, 5  ;;  %v1100_v27 = vor.u32 %v1099_v14, %v1098_v9 }
 0x1da   : > { %v2351_v33 = vmin.u32 %v1043_v45, %v3512_v42  ;;  %v1103_v30 = vor.u32 %v1102_v17, %v1101_v15  ;;  %v1106_v55 = vor.u32 %v1105_v10, %v1104_v26  ;;  %v1110_v20 = vshll.u32 %v4682_v22, %v1095_v24 }
 0x1db   : > { %v1109_v38 = vor.u32 %v1108_v35, %v1107_v13  ;;  %v1111_v32 = vshrl.u32 %v4680_v29, %v1096_v19  ;;  %v3531_v34 = vsel %vm875_vm10, %v959_v12, %v3380_v60  ;;  %v1089_v11 = vor.u32 8388608, %v1088_v31 }
 0x1dc   : > { %v1045_v16 = vclz %v2351_v33  ;;  %v945_v45 = vsub.s32 32, %v3472_v54  ;;  %v951_v7 = vshll.u32 %v950_v41, 23  ;;  %v1195_v17 = vadd.s32 1, %v2358_v53 }
 0x1dd   : > { %v1112_v14 = vor.u32 %v1111_v32, %v1110_v20  ;;  %v4709_v15 = vand.u32 2147483647, %v3178_v62  ;;  %vm1113_vm12 = vcmp.lt.s32.totalorder %v1094_v57, 1  ;;  %vm1115_vm13 = vcmp.lt.s32.totalorder %v1094_v57, 3 }
 0x1de   : > { %v2559_v9 = vpop.eup %2558  ;;  %v2352_v10 = vadd.s32 4294967294, %v1045_v16  ;;  %vm1116_vm14 = vcmp.lt.s32.totalorder %v1094_v57, 4  ;;  %v1121_v31 = vsel %vm1113_vm12, %v1100_v27, %v1103_v30  ;;  %v1125_v41 = vsel %vm1113_vm12, %v1103_v30, %v1106_v55 }
 0x1df   : > { %vm3537_vm11 = vcmp.le.f32.partialorder %v4709_v15, 0.7853982  ;;  %v2561_v60 = vpop.eup %2560  ;;  %v1118_v12 = vsel %vm1116_vm14, %v1106_v55, 2102212464  ;;  %v1122_v26 = vsel %vm1116_vm14, %v1109_v38, 920167782  ;;  %vm549_vm15 = vweird.f32 %v2969_v44 }
 0x1e0   : > { %v3543_v32 = vpop.eup %2562  ;;  %vm653_vm0 = vweird.f32 %v2976_v46  ;;  %v4712_v13 = vmov 683565275   ;;  %vm1114_vm1 = vcmp.lt.s32.totalorder %v1094_v57, 2  ;;  %v1123_v16 = vsel %vm1115_vm13, %v1106_v55, %v1122_v26 }
 0x1e1   : > { %v1097_v35 = vshrl.u32 %v4712_v13, %v1096_v19  ;;  %v1126_v53 = vsel %vm1116_vm14, %v1112_v14, 1326507024  ;;  %v947_v33 = vshrl.u32 %v929_v47, %v945_v45  ;;  %v1124_v20 = vsel %vm1114_vm1, %v1121_v31, %v1123_v16 }
 0x1e2   : > { %v1127_v15 = vsel %vm1115_vm13, %v1109_v38, %v1126_v53  ;;  %v1129_v29 = vshll.u32 %v1089_v11, 8  ;;  %vm761_vm3 = vcmp.eq.s32.totalorder %v3480_v61, 0  ;;  %vm2353_vm4 = vcmp.lt.s32.totalorder %v2352_v10, 0 }
 0x1e3   : > { %v1117_v22 = vsel %vm1113_vm12, %v1097_v35, %v1100_v27  ;;  %v1119_v50 = vsel %vm1115_vm13, %v1103_v30, %v1118_v12  ;;  %v1128_v5 = vsel %vm1114_vm1, %v1125_v41, %v1127_v15  ;;  %2564 = vsinq.f32 %v3492_v56 }
 0x1e4   : > { %v3555_v19 = vmul.u32.u64.low %v1129_v29, %v1128_v5  ;;  %v3556_v1 = vmul.u32.u64.high %v1129_v29, %v1128_v5, %v3555_v19  ;;  %v3558_v55 = vmul.u32.u64.low %v1129_v29, %v1124_v20  ;;  %v3559_v14 = vmul.u32.u64.high %v1129_v29, %v1124_v20, %v3558_v55 }
 0x1e5   : > { %v946_v11 = vshll.u32 %v3394_v51, %v3472_v54  ;;  %v952_v47 = vor.u32 4788187, %v951_v7  ;;  %vm1196_vm5 = vcmp.gt.s32.totalorder %v1195_v17, 0  ;;  %v4713_v27 = vsel %vm3448_vm2, 0, %v3485_v0 }
 0x1e6   : > { %v862_v30 = vadd.s32 3, %v4713_v27  ;;  %v3569_v38 = vsel %vm2353_vm4, 0, %v2352_v10  ;;  %v1120_v5 = vsel %vm1114_vm1, %v1117_v22, %v1119_v50  ;;  %v1197_v45 = vsel %vm1196_vm5, %v1195_v17, 0 }
 0x1e7   : > { %v762_v12 = vxor.u32 2147483648, %v2561_v60  ;;  %v765_v31 = vxor.u32 2147483648, %v2559_v9  ;;  %v948_v26 = vor.u32 %v947_v33, %v946_v11  ;;  %v1199_v41 = vand.u32 31, %v1197_v45 }
 0x1e8   : > { %v962_v51 = vsel %vm3537_vm11, 0, %v3531_v34  ;;  %vm1138_vm6 = vc.u32 %v3556_v1, %v3558_v55  ;;  %v1139_v18 = vadd.s32 1, %v3559_v14  ;;  %v4714_v54 = vand.u32 2147483647, %v3228_v40 }
 0x1e9   : > { %v953_v56 = vand.u32 2147483647, %v952_v47  ;;  %v1053_v22 = vsub.s32 4294967266, %v3569_v38  ;;  %v1136_v57 = vmul.u32 %v1129_v29, %v1120_v5  ;;  %v1200_v50 = vsub.s32 32, %v1199_v41 }
 0x1ea   : > { %v1192_v0 = vand.u32 8388607, %v4714_v54  ;;  %v3584_v7 = vsel %vm549_vm15, nan, %v3499_v8  ;;  %v3589_v34 = vsel %vm653_vm0, nan, %v3502_v37  ;;  %vm764_vm2 = vcmp.eq.s32.totalorder %v3480_v61, 2 }
 0x1eb   : > { %4715 = vst [vmem:[#allocation11_spill] sm:$0xff] %v3584_v7  ;;  %4716 = vst [vmem:[#allocation12_spill] sm:$0xff] %v3589_v34  ;;  %v1140_v17 = vsel %vm1138_vm6, %v1139_v18, %v3559_v14  ;;  %v3593_v10 = vsel %vm764_vm2, %v765_v31, %v2561_v60  ;;  %v3595_v35 = vand.u32 3, %v862_v30  ;;  %v955_v29 = vcvt.s32.f32 %v948_v26 }
 0x1ec   : > { %v1141_v16 = vadd.s32 %v1140_v17, %v1136_v57  ;;  %v3599_v44 = vsel %vm761_vm3, %v2559_v9, %v762_v12  ;;  %v3601_v8 = vadd.s32 3, %v962_v51  ;;  %v1203_v46 = vshrl.u32 %v4700_v36, %v1200_v50 }
 0x1ed   : > { %v1206_v37 = vshrl.u32 %v4701_v6, %v1200_v50  ;;  %v956_v53 = vmul.f32 %v955_v29, %v953_v56  ;;  %v3605_v33 = vadd.s32 127, %v1053_v22  ;;  %v1193_v60 = vor.u32 8388608, %v1192_v0  ;;  %v3611_v47 = vpop.eup %2564 }
 0x1ee   : > { %v1142_v20 = vadd.s32 536870912, %v1141_v16  ;;  %v1202_v15 = vshll.u32 %v4712_v13, %v1199_v41  ;;  %v1205_v19 = vshll.u32 %v4700_v36, %v1199_v41  ;;  %v1209_v14 = vshrl.u32 %v4702_v58, %v1200_v50 }
 0x1ef   : > { %v4717_v11 = vmov 920167782   ;;  %v1198_v30 = vshrl.u32 %v1197_v45, 5  ;;  %v1208_v5 = vshll.u32 %v4701_v6, %v1199_v41  ;;  %v1211_v12 = vshll.u32 %v4702_v58, %v1199_v41 }
 0x1f0   : > { %v1212_v9 = vshrl.u32 %v4717_v11, %v1200_v50  ;;  %v3613_v27 = vshrl.u32 %v1142_v20, 30  ;;  %v1204_v31 = vor.u32 %v1203_v46, %v1202_v15  ;;  %v1207_v26 = vor.u32 %v1206_v37, %v1205_v19 }
 0x1f1   : > { %v1214_v51 = vshll.u32 %v4717_v11, %v1199_v41  ;;  %v4718_v18 = vmov 1326507024   ;;  %v869_v0 = vxor.u32 2147483648, %v3543_v32  ;;  %v1033_v56 = vadd.s32 %v3416_v3, %v3426_v43 }
 0x1f2   : > { %v1215_v54 = vshrl.u32 %v4718_v18, %v1200_v50  ;;  %v1144_v22 = vshll.u32 %v3613_v27, 30  ;;  %v1213_v57 = vor.u32 %v1212_v9, %v1211_v12  ;;  %v866_v45 = vxor.u32 2147483648, %v3611_v47 }
 0x1f3   : > { %vm868_vm7 = vcmp.eq.s32.totalorder %v3595_v35, 2  ;;  %v1210_v17 = vor.u32 %v1209_v14, %v1208_v5  ;;  %v3625_v46 = vshll.u32 %v1193_v60, 8  ;;  %v957_v37 = vxor.u32 2147483648, %v956_v53 }
 0x1f4   : > { %v1216_v29 = vor.u32 %v1215_v54, %v1214_v51  ;;  %v1049_v41 = vsub.s32 32, %v3569_v38  ;;  %v3628_v20 = vsub.s32 %v1141_v16, %v1144_v22  ;;  %vm1217_vm8 = vcmp.lt.s32.totalorder %v1198_v30, 1 }
 0x1f5   : > { %vm865_vm9 = vcmp.eq.s32.totalorder %v3595_v35, 0  ;;  %v1055_v3 = vshll.u32 %v3605_v33, 23  ;;  %vm1220_vm12 = vcmp.lt.s32.totalorder %v1198_v30, 4  ;;  %v1225_v43 = vsel %vm1217_vm8, %v1204_v31, %v1207_v26 }
 0x1f6   : > { %v1292_v15 = vand.u32 2139095040, %v3241_v21  ;;  %v1147_v19 = vsub.s32 0, %v3628_v20  ;;  %vm1218_vm13 = vcmp.lt.s32.totalorder %v1198_v30, 2  ;;  %vm1219_vm14 = vcmp.lt.s32.totalorder %v1198_v30, 3 }
 0x1f7   : > { %v1226_v60 = vsel %vm1220_vm12, %v1213_v57, 920167782  ;;  %v1222_v14 = vsel %vm1220_vm12, %v1210_v17, 2102212464  ;;  %v1229_v16 = vsel %vm1217_vm8, %v1207_v26, %v1210_v17  ;;  %v1230_v5 = vsel %vm1220_vm12, %v1216_v29, 1326507024 }
 0x1f8   : > { %v1227_v9 = vsel %vm1219_vm14, %v1210_v17, %v1226_v60  ;;  %v2355_v12 = vmin.u32 %v1147_v19, %v3628_v20  ;;  %v1201_v33 = vshrl.u32 %v4712_v13, %v1200_v50  ;;  %v1231_v54 = vsel %vm1219_vm14, %v1213_v57, %v1230_v5 }
 0x1f9   : > { %v1228_v51 = vsel %vm1218_vm13, %v1225_v43, %v1227_v9  ;;  %vm979_vm15 = vcmp.lt.s32.totalorder %v3206_v23, 0  ;;  %v1232_v22 = vsel %vm1218_vm13, %v1229_v16, %v1231_v54  ;;  %v1293_v60 = vshrl.u32 %v1292_v15, 23 }
 0x1fa   : > { %v3644_v34 = vmul.u32.u64.low %v3625_v46, %v1228_v51  ;;  %v3645_v7 = vmul.u32.u64.high %v3625_v46, %v1228_v51, %v3644_v34  ;;  %vm760_vm0 = vcmp.lt.s32.totalorder %v3480_v61, 2  ;;  %v958_v17 = vsel %vm875_vm10, %v957_v37, %v956_v53 }
 0x1fb   : > { %v1149_v50 = vclz %v2355_v12  ;;  %v1221_v29 = vsel %vm1217_vm8, %v1201_v33, %v1204_v31  ;;  %v1223_v57 = vsel %vm1219_vm14, %v1207_v26, %v1222_v14  ;;  %vm864_vm1 = vcmp.lt.s32.totalorder %v3595_v35, 2 }
 0x1fc   : > { %v1051_v43 = vshrl.u32 %v1033_v56, %v1049_v41  ;;  %v3655_v19 = vmul.u32.u64.low %v3625_v46, %v1232_v22  ;;  %v3656_v9 = vmul.u32.u64.high %v3625_v46, %v1232_v22, %v3655_v19  ;;  %v2362_v16 = vadd.s32 4294967169, %v1293_v60 }
 0x1fd   : > { %v870_v15 = vsel %vm868_vm7, %v869_v0, %v3611_v47  ;;  %v4719_v5 = vand.u32 2147483647, %v3206_v23  ;;  %v1050_v31 = vshll.u32 %v3512_v42, %v3569_v38  ;;  %v2356_v26 = vadd.s32 4294967294, %v1149_v50 }
 0x1fe   : > { %v1396_v56 = vand.u32 2139095040, %v3245_v49  ;;  %vm757_vm3 = vweird.f32 %v2981_v48  ;;  %v1056_v37 = vor.u32 4788187, %v1055_v3  ;;  %v1224_v41 = vsel %vm1218_vm13, %v1221_v29, %v1223_v57 }
 0x1ff   : > { %vm3663_vm10 = vcmp.le.f32.partialorder %v4719_v5, 0.7853982  ;;  %v1243_v14 = vadd.s32 1, %v3645_v7  ;;  %v1299_v47 = vadd.s32 1, %v2362_v16  ;;  %vm861_vm4 = vweird.f32 %v3066_v63 }
 0x200   : > { %v867_v0 = vsel %vm865_vm9, %v3543_v32, %v866_v45  ;;  %v961_v42 = vsel %vm3537_vm11, %v3178_v62, %v958_v17  ;;  %v1063_v38 = vsub.s32 4, %v3487_v25  ;;  %vm2357_vm5 = vcmp.lt.s32.totalorder %v2356_v26, 0 }
 0x201   : > { %v1052_v12 = vor.u32 %v1051_v43, %v1050_v31  ;;  %v1152_v3 = vsel %vm2357_vm5, 0, %v2356_v26  ;;  %vm1242_vm6 = vc.u32 %v3656_v9, %v3644_v34  ;;  %v1397_v30 = vshrl.u32 %v1396_v56, 23 }
 0x202   : > { %v1153_v33 = vsub.s32 32, %v1152_v3  ;;  %v1157_v51 = vsub.s32 4294967266, %v1152_v3  ;;  %v1240_v54 = vmul.u32 %v3625_v46, %v1224_v41  ;;  %v1289_v22 = vand.u32 2147483647, %v3241_v21 }
 0x203   : > { %2566 = vcosq.f32 %v961_v42  ;;  %v1057_v32 = vand.u32 2147483647, %v1056_v37  ;;  %v1244_v24 = vsel %vm1242_vm6, %v1243_v14, %v3645_v7  ;;  %vm1300_vm11 = vcmp.gt.s32.totalorder %v1299_v47, 0 }
 0x204   : > { %v1064_v45 = vsel %vm979_vm15, %v1063_v38, %v3487_v25  ;;  %v1137_v60 = vadd.s32 %v3558_v55, %v3556_v1  ;;  %v1158_v17 = vadd.s32 127, %v1157_v51  ;;  %v1245_v50 = vadd.s32 %v1244_v24, %v1240_v54 }
 0x205   : > { %v767_v46 = vsel %vm760_vm0, %v3599_v44, %v3593_v10  ;;  %v1059_v29 = vcvt.s32.f32 %v1052_v12  ;;  %v1301_v57 = vsel %vm1300_vm11, %v1299_v47, 0  ;;  %v2366_v43 = vadd.s32 4294967169, %v1397_v30 }
 0x206   : > { %v871_v7 = vsel %vm864_vm1, %v867_v0, %v870_v15  ;;  %v1155_v19 = vshrl.u32 %v1137_v60, %v1153_v33  ;;  %v1159_v16 = vshll.u32 %v1158_v17, 23  ;;  %v1246_v5 = vadd.s32 536870912, %v1245_v50 }
 0x207   : > { %v1060_v25 = vmul.f32 %v1059_v29, %v1057_v32  ;;  %v1066_v1 = vsel %vm3663_vm10, 0, %v1064_v45  ;;  %v1296_v55 = vand.u32 8388607, %v1289_v22  ;;  %v1303_v31 = vand.u32 31, %v1301_v57 }
 0x208   : > { %v3703_v61 = vsel %vm757_vm3, nan, %v767_v46  ;;  %v3706_v10 = vand.u32 3, %v3601_v8  ;;  %v1154_v35 = vshll.u32 %v3628_v20, %v1152_v3  ;;  %v3709_v44 = vshrl.u32 %v1246_v5, 30 }
 0x209   : > { %v3713_v15 = vsel %vm861_vm4, nan, %v871_v7  ;;  %v1160_v26 = vor.u32 4788187, %v1159_v16  ;;  %v1304_v56 = vsub.s32 32, %v1303_v31  ;;  %v1403_v37 = vadd.s32 1, %v2366_v43 }
 0x20a   : > { %2568 = vsinq.f32 %v961_v42  ;;  %v1070_v41 = vadd.s32 3, %v1066_v1  ;;  %v1156_v14 = vor.u32 %v1155_v19, %v1154_v35  ;;  %v1248_v48 = vshll.u32 %v3709_v44, 30 }
 0x20b   : > { %v1061_v47 = vxor.u32 2147483648, %v1060_v25  ;;  %v1297_v0 = vor.u32 8388608, %v1296_v55  ;;  %v1307_v8 = vshrl.u32 %v4700_v36, %v1304_v56  ;;  %v1310_v20 = vshrl.u32 %v4701_v6, %v1304_v56 }
 0x20c   : > { %v3718_v38 = vsub.s32 %v1245_v50, %v1248_v48  ;;  %v3720_v12 = vshrl.u32 %v1301_v57, 5  ;;  %v1313_v63 = vshrl.u32 %v4702_v58, %v1304_v56  ;;  %v1316_v3 = vshrl.u32 %v4717_v11, %v1304_v56 }
 0x20d   : > { %v3724_v30 = vpop.eup %2566  ;;  %v1161_v42 = vand.u32 2147483647, %v1160_v26  ;;  %v1306_v33 = vshll.u32 %v4712_v13, %v1303_v31  ;;  %v1309_v51 = vshll.u32 %v4700_v36, %v1303_v31  ;;  %vm1404_vm2 = vcmp.gt.s32.totalorder %v1403_v37, 0 }
 0x20e   : > { %v1163_v54 = vcvt.s32.f32 %v1156_v14  ;;  %v1251_v32 = vsub.s32 0, %v3718_v38  ;;  %v1312_v24 = vshll.u32 %v4701_v6, %v1303_v31  ;;  %v1315_v45 = vshll.u32 %v4702_v58, %v1303_v31 }
 0x20f   : > { %v1308_v60 = vor.u32 %v1307_v8, %v1306_v33  ;;  %v1311_v17 = vor.u32 %v1310_v20, %v1309_v51  ;;  %v1318_v50 = vshll.u32 %v4717_v11, %v1303_v31  ;;  %v1319_v46 = vshrl.u32 %v4718_v18, %v1304_v56 }
 0x210   : > { %v973_v29 = vxor.u32 2147483648, %v3724_v30  ;;  %vm1083_vm7 = vcmp.lt.s32.totalorder %v3220_v2, 0  ;;  %v2359_v57 = vmin.u32 %v1251_v32, %v3718_v38  ;;  %v1314_v43 = vor.u32 %v1313_v63, %v1312_v24 }
 0x211   : > { %v1317_v7 = vor.u32 %v1316_v3, %v1315_v45  ;;  %vm972_vm8 = vcmp.eq.s32.totalorder %v3706_v10, 2  ;;  %v1062_v19 = vsel %vm979_vm15, %v1061_v47, %v1060_v25  ;;  %v1164_v16 = vmul.f32 %v1163_v54, %v1161_v42 }
 0x212   : > { %v1167_v5 = vsub.s32 4, %v3613_v27  ;;  %v1320_v1 = vor.u32 %v1319_v46, %v1318_v50  ;;  %v1253_v55 = vclz %v2359_v57  ;;  %vm1321_vm9 = vcmp.lt.s32.totalorder %v3720_v12, 1 }
 0x213   : > { %v1337_v31 = vshll.u32 %v1297_v0, 8  ;;  %v1405_v35 = vsel %vm1404_vm2, %v1403_v37, 0  ;;  %v4722_v26 = vand.u32 2147483647, %v3220_v2  ;;  %v1305_v48 = vshrl.u32 %v4712_v13, %v1304_v56 }
 0x214   : > { %vm1323_vm13 = vcmp.lt.s32.totalorder %v3720_v12, 3  ;;  %vm1324_vm14 = vcmp.lt.s32.totalorder %v3720_v12, 4  ;;  %v1329_v25 = vsel %vm1321_vm9, %v1308_v60, %v1311_v17  ;;  %v3753_v47 = vpop.eup %2568  ;;  %v2360_v0 = vadd.s32 4294967294, %v1253_v55 }
 0x215   : > { %vm3744_vm12 = vcmp.le.f32.partialorder %v4722_v26, 0.7853982  ;;  %v1326_v8 = vsel %vm1324_vm14, %v1314_v43, 2102212464  ;;  %v1330_v37 = vsel %vm1324_vm14, %v1317_v7, 920167782  ;;  %v1333_v20 = vsel %vm1321_vm9, %v1311_v17, %v1314_v43 }
 0x216   : > { %v1165_v63 = vxor.u32 2147483648, %v1164_v16  ;;  %vm1322_vm15 = vcmp.lt.s32.totalorder %v3720_v12, 2  ;;  %v1331_v56 = vsel %vm1323_vm13, %v1314_v43, %v1330_v37  ;;  %v1334_v3 = vsel %vm1324_vm14, %v1320_v1, 1326507024 }
 0x217   : > { %vm2361_vm0 = vcmp.lt.s32.totalorder %v2360_v0, 0  ;;  %v1325_v42 = vsel %vm1321_vm9, %v1305_v48, %v1308_v60  ;;  %v1332_v33 = vsel %vm1322_vm15, %v1329_v25, %v1331_v56  ;;  %v1335_v51 = vsel %vm1323_vm13, %v1317_v7, %v1334_v3 }
 0x218   : > { %v1327_v54 = vsel %vm1323_vm13, %v1311_v17, %v1326_v8  ;;  %v1336_v32 = vsel %vm1322_vm15, %v1333_v20, %v1335_v51  ;;  %v3770_v24 = vmul.u32.u64.low %v1337_v31, %v1332_v33  ;;  %v3771_v45 = vmul.u32.u64.high %v1337_v31, %v1332_v33, %v3770_v24 }
 0x219   : > { %v1065_v60 = vsel %vm3663_vm10, %v3206_v23, %v1062_v19  ;;  %v3777_v50 = vsel %vm2361_vm0, 0, %v2360_v0  ;;  %v1393_v46 = vand.u32 2147483647, %v3245_v49  ;;  %v1407_v57 = vand.u32 31, %v1405_v35 }
 0x21a   : > { %v3780_v43 = vand.u32 3, %v1070_v41  ;;  %v1166_v17 = vsel %vm1083_vm7, %v1165_v63, %v1164_v16  ;;  %v3784_v7 = vmul.u32.u64.low %v1337_v31, %v1336_v32  ;;  %v3785_v1 = vmul.u32.u64.high %v1337_v31, %v1336_v32, %v3784_v7 }
 0x21b   : > { %v970_v55 = vxor.u32 2147483648, %v3753_v47  ;;  %v3791_v53 = vsel %vm972_vm8, %v973_v29, %v3753_v47  ;;  %v1328_v19 = vsel %vm1322_vm15, %v1325_v42, %v1327_v54  ;;  %v1408_v26 = vsub.s32 32, %v1407_v57 }
 0x21c   : > { %2570 = vcosq.f32 %v1065_v60  ;;  %v3798_v41 = vsel %vm1083_vm7, %v1167_v5, %v3613_v27  ;;  %v1261_v16 = vsub.s32 4294967266, %v3777_v50  ;;  %v1347_v48 = vadd.s32 1, %v3771_v45 }
 0x21d   : > { %2572 = vsinq.f32 %v1065_v60  ;;  %v1169_v29 = vsel %vm3744_vm12, %v3220_v2, %v1166_v17  ;;  %v1400_v12 = vand.u32 8388607, %v1393_v46  ;;  %v1411_v25 = vshrl.u32 %v4700_v36, %v1408_v26 }
 0x21e   : > { %v1344_v0 = vmul.u32 %v1337_v31, %v1328_v19  ;;  %vm1346_vm1 = vc.u32 %v3785_v1, %v3770_v24  ;;  %v3810_v27 = vshrl.u32 %v1405_v35, 5  ;;  %v1414_v5 = vshrl.u32 %v4701_v6, %v1408_v26 }
 0x21f   : > { %v1257_v8 = vsub.s32 32, %v3777_v50  ;;  %v1348_v37 = vsel %vm1346_vm1, %v1347_v48, %v3771_v45  ;;  %v1410_v20 = vshll.u32 %v4712_v13, %v1407_v57  ;;  %v1413_v63 = vshll.u32 %v4700_v36, %v1407_v57 }
 0x220   : > { %v1262_v56 = vadd.s32 127, %v1261_v16  ;;  %v1349_v3 = vadd.s32 %v1348_v37, %v1344_v0  ;;  %v1416_v42 = vshll.u32 %v4701_v6, %v1407_v57  ;;  %v1419_v31 = vshll.u32 %v4702_v58, %v1407_v57 }
 0x221   : > { %v1412_v33 = vor.u32 %v1411_v25, %v1410_v20  ;;  %v1415_v51 = vor.u32 %v1414_v5, %v1413_v63  ;;  %v1417_v35 = vshrl.u32 %v4702_v58, %v1408_v26  ;;  %v1420_v54 = vshrl.u32 %v4717_v11, %v1408_v26 }
 0x222   : > { %vm969_vm10 = vcmp.eq.s32.totalorder %v3706_v10, 0  ;;  %v1170_v32 = vsel %vm3744_vm12, 0, %v3798_v41  ;;  %v1241_v45 = vadd.s32 %v3644_v34, %v3656_v9  ;;  %v1350_v60 = vadd.s32 536870912, %v1349_v3 }
 0x223   : > { %v1423_v17 = vshrl.u32 %v4718_v18, %v1408_v26  ;;  %v1401_v7 = vor.u32 8388608, %v1400_v12  ;;  %v1418_v19 = vor.u32 %v1417_v35, %v1416_v42  ;;  %v1421_v16 = vor.u32 %v1420_v54, %v1419_v31 }
 0x224   : > { %v1422_v48 = vshll.u32 %v4717_v11, %v1407_v57  ;;  %2574 = vcosq.f32 %v1169_v29  ;;  %v1263_v25 = vshll.u32 %v1262_v56, 23  ;;  %v3829_v0 = vshrl.u32 %v1350_v60, 30 }
 0x225   : > { %vm1425_vm3 = vcmp.lt.s32.totalorder %v3810_v27, 1  ;;  %v1259_v5 = vshrl.u32 %v1241_v45, %v1257_v8  ;;  %vm1428_vm4 = vcmp.lt.s32.totalorder %v3810_v27, 4  ;;  %vm968_vm5 = vcmp.lt.s32.totalorder %v3706_v10, 2 }
 0x226   : > { %v1424_v14 = vor.u32 %v1423_v17, %v1422_v48  ;;  %v1433_v34 = vsel %vm1425_vm3, %v1412_v33, %v1415_v51  ;;  %v2571_v9 = vpop.eup %2570  ;;  %v1258_v41 = vshll.u32 %v3718_v38, %v3777_v50  ;;  %v1352_v57 = vshll.u32 %v3829_v0, 30 }
 0x227   : > { %vm1427_vm6 = vcmp.lt.s32.totalorder %v3810_v27, 3  ;;  %v1434_v12 = vsel %vm1428_vm4, %v1421_v16, 920167782  ;;  %v2573_v8 = vpop.eup %2572  ;;  %v1409_v37 = vshrl.u32 %v4712_v13, %v1408_v26  ;;  %vm1426_vm11 = vcmp.lt.s32.totalorder %v3810_v27, 2 }
 0x228   : > { %v1430_v20 = vsel %vm1428_vm4, %v1418_v19, 2102212464  ;;  %v1435_v63 = vsel %vm1427_vm6, %v1418_v19, %v1434_v12  ;;  %v1264_v56 = vor.u32 4788187, %v1263_v25  ;;  %v3848_v38 = vsub.s32 %v1349_v3, %v1352_v57 }
 0x229   : > { %v1436_v50 = vsel %vm1426_vm11, %v1433_v34, %v1435_v63  ;;  %v1437_v42 = vsel %vm1425_vm3, %v1415_v51, %v1418_v19  ;;  %2576 = vsinq.f32 %v1169_v29  ;;  %v1260_v31 = vor.u32 %v1259_v5, %v1258_v41 }
 0x22a   : > { %v1438_v26 = vsel %vm1428_vm4, %v1424_v14, 1326507024  ;;  %v1441_v35 = vshll.u32 %v1401_v7, 8  ;;  %vm965_vm2 = vweird.f32 %v3178_v62  ;;  %vm1187_vm7 = vcmp.lt.s32.totalorder %v3228_v40, 0 }
 0x22b   : > { %v1355_v54 = vsub.s32 0, %v3848_v38  ;;  %v1429_v3 = vsel %vm1425_vm3, %v1409_v37, %v1412_v33  ;;  %v1431_v45 = vsel %vm1427_vm6, %v1415_v51, %v1430_v20  ;;  %v1439_v29 = vsel %vm1427_vm6, %v1421_v16, %v1438_v26 }
 0x22c   : > { %v971_v60 = vsel %vm969_vm10, %v3724_v30, %v970_v55  ;;  %v1440_v17 = vsel %vm1426_vm11, %v1437_v42, %v1439_v29  ;;  %v3872_v7 = vmul.u32.u64.low %v1441_v35, %v1436_v50  ;;  %v3873_v19 = vmul.u32.u64.high %v1441_v35, %v1436_v50, %v3872_v7 }
 0x22d   : > { %vm1072_vm8 = vcmp.lt.s32.totalorder %v3780_v43, 2  ;;  %v1265_v33 = vand.u32 2147483647, %v1264_v56  ;;  %v2363_v51 = vmin.u32 %v1355_v54, %v3848_v38  ;;  %vm1073_vm9 = vcmp.eq.s32.totalorder %v3780_v43, 0 }
 0x22e   : > { %v3878_v48 = vmul.u32.u64.low %v1441_v35, %v1440_v17  ;;  %v3879_v16 = vmul.u32.u64.high %v1441_v35, %v1440_v17, %v3878_v48  ;;  %v1174_v47 = vadd.s32 3, %v1170_v32  ;;  %v1432_v30 = vsel %vm1426_vm11, %v1429_v3, %v1431_v45  ;;  %v2575_v25 = vpop.eup %2574 }
 0x22f   : > { %v1500_v55 = vand.u32 2139095040, %v3255_v59  ;;  %v1074_v5 = vxor.u32 2147483648, %v2573_v8  ;;  %v1077_v14 = vxor.u32 2147483648, %v2571_v9  ;;  %v4725_v34 = vand.u32 2147483647, %v3228_v40 }
 0x230   : > { %v1267_v57 = vcvt.s32.f32 %v1260_v31  ;;  %v1357_v12 = vclz %v2363_v51  ;;  %v975_v32 = vsel %vm968_vm5, %v971_v60, %v3791_v53  ;;  %v1271_v27 = vsub.s32 4, %v3709_v44 }
 0x231   : > { %vm3887_vm12 = vcmp.le.f32.partialorder %v4725_v34, 0.7853982  ;;  %v1451_v37 = vadd.s32 1, %v3873_v19  ;;  %v1501_v20 = vshrl.u32 %v1500_v55, 23  ;;  %v1448_v50 = vmul.u32 %v1441_v35, %v1432_v30 }
 0x232   : > { %v1268_v63 = vmul.f32 %v1267_v57, %v1265_v33  ;;  %v2364_v56 = vadd.s32 4294967294, %v1357_v12  ;;  %vm1450_vm13 = vc.u32 %v3879_v16, %v3872_v7  ;;  %vm1069_vm14 = vweird.f32 %v3206_v23 }
 0x233   : > { %vm1076_vm15 = vcmp.eq.s32.totalorder %v3780_v43, 2  ;;  %v3900_v42 = vand.u32 3, %v1174_v47  ;;  %v1452_v10 = vsel %vm1450_vm13, %v1451_v37, %v3873_v19  ;;  %v2370_v53 = vadd.s32 4294967169, %v1501_v20  ;;  %v2577_v3 = vpop.eup %2576 }
 0x234   : > { %v1075_v31 = vsel %vm1073_vm9, %v2571_v9, %v1074_v5  ;;  %v1078_v26 = vsel %vm1076_vm15, %v1077_v14, %v2573_v8  ;;  %vm2365_vm0 = vcmp.lt.s32.totalorder %v2364_v56, 0  ;;  %v1453_v54 = vadd.s32 %v1452_v10, %v1448_v50 }
 0x235   : > { %v3907_v35 = vsel %vm965_vm2, nan, %v975_v32  ;;  %v1272_v45 = vsel %vm1187_vm7, %v1271_v27, %v3709_v44  ;;  %v1360_v29 = vsel %vm2365_vm0, 0, %v2364_v56  ;;  %v1507_v60 = vadd.s32 1, %v2370_v53 }
 0x236   : > { %v1269_v17 = vxor.u32 2147483648, %v1268_v63  ;;  %v1361_v19 = vsub.s32 32, %v1360_v29  ;;  %v1365_v33 = vsub.s32 4294967266, %v1360_v29  ;;  %v1497_v51 = vand.u32 2147483647, %v3255_v59 }
 0x237   : > { %v1079_v9 = vsel %vm1072_vm8, %v1075_v31, %v1078_v26  ;;  %vm1177_vm1 = vcmp.eq.s32.totalorder %v3900_v42, 0  ;;  %v1454_v8 = vadd.s32 536870912, %v1453_v54  ;;  %vm1508_vm10 = vcmp.gt.s32.totalorder %v1507_v60, 0 }
 0x238   : > { %v1181_v62 = vxor.u32 2147483648, %v2575_v25  ;;  %v1345_v48 = vadd.s32 %v3770_v24, %v3785_v1  ;;  %v1366_v47 = vadd.s32 127, %v1365_v33  ;;  %v1509_v44 = vsel %vm1508_vm10, %v1507_v60, 0 }
 0x239   : > { %v1178_v30 = vxor.u32 2147483648, %v2577_v3  ;;  %v1274_v55 = vsel %vm3887_vm12, 0, %v1272_v45  ;;  %v3920_v5 = vshrl.u32 %v1454_v8, 30  ;;  %v1511_v14 = vand.u32 31, %v1509_v44 }
 0x23a   : > { %v1270_v43 = vsel %vm1187_vm7, %v1269_v17, %v1268_v63  ;;  %v1363_v34 = vshrl.u32 %v1345_v48, %v1361_v19  ;;  %v1504_v57 = vand.u32 8388607, %v1497_v51  ;;  %v1604_v12 = vand.u32 2139095040, %v3274_v39 }
 0x23b   : > { %vm1180_vm3 = vcmp.eq.s32.totalorder %v3900_v42, 2  ;;  %v1367_v24 = vshll.u32 %v1366_v47, 23  ;;  %v1456_v1 = vshll.u32 %v3920_v5, 30  ;;  %v1512_v32 = vsub.s32 32, %v1511_v14 }
 0x23c   : > { %v3931_v27 = vsel %vm1069_vm14, nan, %v1079_v9  ;;  %v3933_v37 = vsel %vm1180_vm3, %v1181_v62, %v2577_v3  ;;  %v1278_v20 = vadd.s32 3, %v1274_v55  ;;  %v1362_v63 = vshll.u32 %v3848_v38, %v1360_v29 }
 0x23d   : > { %v3938_v56 = vsel %vm1177_vm1, %v2575_v25, %v1178_v30  ;;  %v1273_v50 = vsel %vm3887_vm12, %v3228_v40, %v1270_v43  ;;  %v3943_v10 = vsub.s32 %v1453_v54, %v1456_v1  ;;  %v1515_v53 = vshrl.u32 %v4700_v36, %v1512_v32 }
 0x23e   : > { %v1364_v23 = vor.u32 %v1363_v34, %v1362_v63  ;;  %v1505_v31 = vor.u32 8388608, %v1504_v57  ;;  %v1518_v26 = vshrl.u32 %v4701_v6, %v1512_v32  ;;  %v1605_v3 = vshrl.u32 %v1604_v12, 23 }
 0x23f   : > { %v1368_v45 = vor.u32 4788187, %v1367_v24  ;;  %v1459_v38 = vsub.s32 0, %v3943_v10  ;;  %v1514_v29 = vshll.u32 %v4712_v13, %v1511_v14  ;;  %v1521_v25 = vshrl.u32 %v4702_v58, %v1512_v32 }
 0x240   : > { %v1517_v60 = vshll.u32 %v4700_v36, %v1511_v14  ;;  %v1520_v41 = vshll.u32 %v4701_v6, %v1511_v14  ;;  %v1523_v54 = vshll.u32 %v4702_v58, %v1511_v14  ;;  %v1524_v17 = vshrl.u32 %v4717_v11, %v1512_v32 }
 0x241   : > { %2578 = vcosq.f32 %v1273_v50  ;;  %v2367_v19 = vmin.u32 %v1459_v38, %v3943_v10  ;;  %v1510_v33 = vshrl.u32 %v1509_v44, 5  ;;  %v1516_v9 = vor.u32 %v1515_v53, %v1514_v29 }
 0x242   : > { %vm1291_vm4 = vcmp.lt.s32.totalorder %v3241_v21, 0  ;;  %v1519_v8 = vor.u32 %v1518_v26, %v1517_v60  ;;  %v1522_v62 = vor.u32 %v1521_v25, %v1520_v41  ;;  %v1525_v48 = vor.u32 %v1524_v17, %v1523_v54 }
 0x243   : > { %v1527_v47 = vshrl.u32 %v4718_v18, %v1512_v32  ;;  %2580 = vsinq.f32 %v1273_v50  ;;  %v1375_v30 = vsub.s32 4, %v3829_v0  ;;  %v1461_v55 = vclz %v2367_v19 }
 0x244   : > { %v1526_v43 = vshll.u32 %v4717_v11, %v1511_v14  ;;  %vm1176_vm5 = vcmp.lt.s32.totalorder %v3900_v42, 2  ;;  %v1369_v34 = vand.u32 2147483647, %v1368_v45  ;;  %v1371_v57 = vcvt.s32.f32 %v1364_v23 }
 0x245   : > { %v1545_v12 = vshll.u32 %v1505_v31, 8  ;;  %v2374_v44 = vadd.s32 4294967169, %v1605_v3  ;;  %v2368_v24 = vadd.s32 4294967294, %v1461_v55  ;;  %vm1529_vm6 = vcmp.lt.s32.totalorder %v1510_v33, 1 }
 0x246   : > { %v1528_v1 = vor.u32 %v1527_v47, %v1526_v43  ;;  %vm1532_vm11 = vcmp.lt.s32.totalorder %v1510_v33, 4  ;;  %vm3962_vm2 = vcmp.le.f32.partialorder %v1289_v22, 0.7853982  ;;  %vm1531_vm7 = vcmp.lt.s32.totalorder %v1510_v33, 3 }
 0x247   : > { %v1534_v50 = vsel %vm1532_vm11, %v1522_v62, 2102212464  ;;  %v1537_v14 = vsel %vm1529_vm6, %v1516_v9, %v1519_v8  ;;  %v1538_v53 = vsel %vm1532_vm11, %v1525_v48, 920167782  ;;  %vm2369_vm8 = vcmp.lt.s32.totalorder %v2368_v24, 0 }
 0x248   : > { %v1513_v23 = vshrl.u32 %v4712_v13, %v1512_v32  ;;  %vm1530_vm9 = vcmp.lt.s32.totalorder %v1510_v33, 2  ;;  %v1539_v31 = vsel %vm1531_vm7, %v1522_v62, %v1538_v53  ;;  %v1372_v26 = vmul.f32 %v1371_v57, %v1369_v34 }
 0x249   : > { %v1464_v3 = vsel %vm2369_vm8, 0, %v2368_v24  ;;  %v1540_v22 = vsel %vm1530_vm9, %v1537_v14, %v1539_v31  ;;  %v1541_v45 = vsel %vm1529_vm6, %v1519_v8, %v1522_v62  ;;  %v1535_v25 = vsel %vm1531_vm7, %v1519_v8, %v1534_v50 }
 0x24a   : > { %v1469_v38 = vsub.s32 4294967266, %v1464_v3  ;;  %v1533_v29 = vsel %vm1529_vm6, %v1513_v23, %v1516_v9  ;;  %v1542_v60 = vsel %vm1532_vm11, %v1528_v1, 1326507024  ;;  %vm1173_vm12 = vweird.f32 %v3220_v2 }
 0x24b   : > { %v1465_v41 = vsub.s32 32, %v1464_v3  ;;  %v1543_v32 = vsel %vm1531_vm7, %v1525_v48, %v1542_v60  ;;  %v3978_v54 = vmul.u32.u64.low %v1545_v12, %v1540_v22  ;;  %v3979_v17 = vmul.u32.u64.high %v1545_v12, %v1540_v22, %v3978_v54  ;;  %v3982_v19 = vpop.eup %2578 }
 0x24c   : > { %v3984_v47 = vand.u32 3, %v1278_v20  ;;  %v1376_v9 = vsel %vm1291_vm4, %v1375_v30, %v3829_v0  ;;  %v1470_v8 = vadd.s32 127, %v1469_v38  ;;  %v1544_v62 = vsel %vm1530_vm9, %v1541_v45, %v1543_v32 }
 0x24d   : > { %v1449_v55 = vadd.s32 %v3872_v7, %v3879_v16  ;;  %v3992_v43 = vmul.u32.u64.low %v1545_v12, %v1544_v62  ;;  %v3993_v48 = vmul.u32.u64.high %v1545_v12, %v1544_v62, %v3992_v43  ;;  %v1611_v34 = vadd.s32 1, %v2374_v44  ;;  %v2581_v57 = vpop.eup %2580 }
 0x24e   : > { %v1183_v20 = vsel %vm1176_vm5, %v3938_v56, %v3933_v37  ;;  %v1471_v24 = vshll.u32 %v1470_v8, 23  ;;  %v1536_v1 = vsel %vm1530_vm9, %v1533_v29, %v1535_v25  ;;  %v1601_v0 = vand.u32 2147483647, %v3274_v39 }
 0x24f   : > { %v1373_v30 = vxor.u32 2147483648, %v1372_v26  ;;  %v1467_v50 = vshrl.u32 %v1449_v55, %v1465_v41  ;;  %v1555_v14 = vadd.s32 1, %v3979_v17  ;;  %vm1612_vm13 = vcmp.gt.s32.totalorder %v1611_v34, 0 }
 0x250   : > { %v1285_v7 = vxor.u32 2147483648, %v3982_v19  ;;  %v1378_v16 = vsel %vm3962_vm2, 0, %v1376_v9  ;;  %v1466_v44 = vshll.u32 %v3943_v10, %v1464_v3  ;;  %v1613_v53 = vsel %vm1612_vm13, %v1611_v34, 0 }
 0x251   : > { %v1472_v42 = vor.u32 4788187, %v1471_v24  ;;  %v1552_v37 = vmul.u32 %v1545_v12, %v1536_v1  ;;  %vm1554_vm14 = vc.u32 %v3993_v48, %v3978_v54  ;;  %v1615_v56 = vand.u32 31, %v1613_v53 }
 0x252   : > { %vm1281_vm15 = vcmp.eq.s32.totalorder %v3984_v47, 0  ;;  %vm1284_vm0 = vcmp.eq.s32.totalorder %v3984_v47, 2  ;;  %vm1395_vm1 = vcmp.lt.s32.totalorder %v3245_v49, 0  ;;  %v1556_v33 = vsel %vm1554_vm14, %v1555_v14, %v3979_v17 }
 0x253   : > { %v1608_v23 = vand.u32 8388607, %v1601_v0  ;;  %v1374_v10 = vsel %vm1291_vm4, %v1373_v30, %v1372_v26  ;;  %v1468_v31 = vor.u32 %v1467_v50, %v1466_v44  ;;  %v1557_v12 = vadd.s32 %v1556_v33, %v1552_v37 }
 0x254   : > { %v1616_v3 = vsub.s32 32, %v1615_v56  ;;  %v4018_v22 = vsel %vm1173_vm12, nan, %v1183_v20  ;;  %v1282_v45 = vxor.u32 2147483648, %v2581_v57  ;;  %v1286_v38 = vsel %vm1284_vm0, %v1285_v7, %v2581_v57 }
 0x255   : > { %v1382_v29 = vadd.s32 3, %v1378_v16  ;;  %v1473_v25 = vand.u32 2147483647, %v1472_v42  ;;  %v1479_v60 = vsub.s32 4, %v3920_v5  ;;  %v1558_v41 = vadd.s32 536870912, %v1557_v12 }
 0x256   : > { %v1619_v32 = vshrl.u32 %v4700_v36, %v1616_v3  ;;  %v1377_v26 = vsel %vm3962_vm2, %v3241_v21, %v1374_v10  ;;  %v1609_v17 = vor.u32 8388608, %v1608_v23  ;;  %v1622_v9 = vshrl.u32 %v4701_v6, %v1616_v3 }
 0x257   : > { %v1708_v2 = vand.u32 2139095040, %v3278_v28  ;;  %v1475_v8 = vcvt.s32.f32 %v1468_v31  ;;  %v4027_v62 = vshrl.u32 %v1558_v41, 30  ;;  %v1618_v55 = vshll.u32 %v4712_v13, %v1615_v56 }
 0x258   : > { %v1625_v43 = vshrl.u32 %v4702_v58, %v1616_v3  ;;  %vm1280_vm10 = vcmp.lt.s32.totalorder %v3984_v47, 2  ;;  %v1614_v34 = vshrl.u32 %v1613_v53, 5  ;;  %v1621_v57 = vshll.u32 %v4700_v36, %v1615_v56 }
 0x259   : > { %v1627_v63 = vshll.u32 %v4702_v58, %v1615_v56  ;;  %v1628_v20 = vshrl.u32 %v4717_v11, %v1616_v3  ;;  %v1476_v24 = vmul.f32 %v1475_v8, %v1473_v25  ;;  %v1560_v1 = vshll.u32 %v4027_v62, 30 }
 0x25a   : > { %v1620_v30 = vor.u32 %v1619_v32, %v1618_v55  ;;  %v1624_v50 = vshll.u32 %v4701_v6, %v1615_v56  ;;  %vm4039_vm3 = vcmp.le.f32.partialorder %v1393_v46, 0.7853982  ;;  %v1623_v7 = vor.u32 %v1622_v9, %v1621_v57 }
 0x25b   : > { %v1629_v16 = vor.u32 %v1628_v20, %v1627_v63  ;;  %v1630_v44 = vshll.u32 %v4717_v11, %v1615_v56  ;;  %v1631_v53 = vshrl.u32 %v4718_v18, %v1616_v3  ;;  %v1283_v42 = vsel %vm1281_vm15, %v3982_v19, %v1282_v45 }
 0x25c   : > { %v1480_v37 = vsel %vm1395_vm1, %v1479_v60, %v3920_v5  ;;  %v4051_v33 = vsub.s32 %v1557_v12, %v1560_v1  ;;  %v1626_v46 = vor.u32 %v1625_v43, %v1624_v50  ;;  %2582 = vcosq.f32 %v1377_v26 }
 0x25d   : > { %v1632_v23 = vor.u32 %v1631_v53, %v1630_v44  ;;  %v1649_v10 = vshll.u32 %v1609_v17, 8  ;;  %v1709_v31 = vshrl.u32 %v1708_v2, 23  ;;  %v1617_v56 = vshrl.u32 %v4712_v13, %v1616_v3 }
 0x25e   : > { %v1563_v25 = vsub.s32 0, %v4051_v33  ;;  %vm1633_vm4 = vcmp.lt.s32.totalorder %v1614_v34, 1  ;;  %vm1636_vm5 = vcmp.lt.s32.totalorder %v1614_v34, 4  ;;  %v1477_v41 = vxor.u32 2147483648, %v1476_v24 }
 0x25f   : > { %vm1635_vm6 = vcmp.lt.s32.totalorder %v1614_v34, 3  ;;  %v1641_v19 = vsel %vm1633_vm4, %v1620_v30, %v1623_v7  ;;  %v1642_v45 = vsel %vm1636_vm5, %v1629_v16, 920167782  ;;  %vm1634_vm11 = vcmp.lt.s32.totalorder %v1614_v34, 2 }
 0x260   : > { %v2371_v5 = vmin.u32 %v1563_v25, %v4051_v33  ;;  %v1638_v12 = vsel %vm1636_vm5, %v1626_v46, 2102212464  ;;  %v1643_v60 = vsel %vm1635_vm6, %v1626_v46, %v1642_v45  ;;  %v1645_v17 = vsel %vm1633_vm4, %v1623_v7, %v1626_v46 }
 0x261   : > { %v1644_v32 = vsel %vm1634_vm11, %v1641_v19, %v1643_v60  ;;  %v1646_v9 = vsel %vm1636_vm5, %v1632_v23, 1326507024  ;;  %v2378_v2 = vadd.s32 4294967169, %v1709_v31  ;;  %v4062_v3 = vsel %vm1280_vm10, %v1283_v42, %v1286_v38 }
 0x262   : > { %v4064_v8 = vand.u32 3, %v1382_v29  ;;  %v1565_v55 = vclz %v2371_v5  ;;  %v1637_v43 = vsel %vm1633_vm4, %v1617_v56, %v1620_v30  ;;  %v1639_v57 = vsel %vm1635_vm6, %v1623_v7, %v1638_v12 }
 0x263   : > { %v1647_v63 = vsel %vm1635_vm6, %v1629_v16, %v1646_v9  ;;  %v4069_v20 = vmul.u32.u64.low %v1649_v10, %v1644_v32  ;;  %v4070_v1 = vmul.u32.u64.high %v1649_v10, %v1644_v32, %v4069_v20  ;;  %v1482_v50 = vsel %vm4039_vm3, 0, %v1480_v37 }
 0x264   : > { %vm1499_vm2 = vcmp.lt.s32.totalorder %v3255_v59, 0  ;;  %v2372_v47 = vadd.s32 4294967294, %v1565_v55  ;;  %v1648_v38 = vsel %vm1634_vm11, %v1645_v17, %v1647_v63  ;;  %v1715_v29 = vadd.s32 1, %v2378_v2 }
 0x265   : > { %v1478_v30 = vsel %vm1395_vm1, %v1477_v41, %v1476_v24  ;;  %v4079_v44 = vmul.u32.u64.low %v1649_v10, %v1648_v38  ;;  %v4080_v7 = vmul.u32.u64.high %v1649_v10, %v1648_v38, %v4079_v44  ;;  %v1705_v16 = vand.u32 2147483647, %v3278_v28 }
 0x266   : > { %2584 = vsinq.f32 %v1377_v26  ;;  %vm2373_vm7 = vcmp.lt.s32.totalorder %v2372_v47, 0  ;;  %v1640_v53 = vsel %vm1634_vm11, %v1637_v43, %v1639_v57  ;;  %vm1716_vm8 = vcmp.gt.s32.totalorder %v1715_v29, 0  ;;  %v4084_v42 = vpop.eup %2582 }
 0x267   : > { %v1486_v37 = vadd.s32 3, %v1482_v50  ;;  %v1553_v46 = vadd.s32 %v3978_v54, %v3993_v48  ;;  %v1568_v23 = vsel %vm2373_vm7, 0, %v2372_v47  ;;  %v1659_v31 = vadd.s32 1, %v4070_v1 }
 0x268   : > { %v1481_v24 = vsel %vm4039_vm3, %v3245_v49, %v1478_v30  ;;  %v1569_v25 = vsub.s32 32, %v1568_v23  ;;  %v1573_v56 = vsub.s32 4294967266, %v1568_v23  ;;  %v1717_v26 = vsel %vm1716_vm8, %v1715_v29, 0 }
 0x269   : > { %v1583_v34 = vsub.s32 4, %v4027_v62  ;;  %v1656_v41 = vmul.u32 %v1649_v10, %v1640_v53  ;;  %vm1658_vm9 = vc.u32 %v4080_v7, %v4069_v20  ;;  %v1712_v19 = vand.u32 8388607, %v1705_v16 }
 0x26a   : > { %vm1388_vm12 = vcmp.eq.s32.totalorder %v4064_v8, 2  ;;  %v1570_v54 = vshll.u32 %v4051_v33, %v1568_v23  ;;  %v1571_v48 = vshrl.u32 %v1553_v46, %v1569_v25  ;;  %v1574_v45 = vadd.s32 127, %v1573_v56 }
 0x26b   : > { %v1660_v14 = vsel %vm1658_vm9, %v1659_v31, %v4070_v1  ;;  %2586 = vcosq.f32 %v1481_v24  ;;  %v4100_v5 = vand.u32 3, %v1486_v37  ;;  %vm4104_vm13 = vcmp.le.f32.partialorder %v1497_v51, 0.7853982 }
 0x26c   : > { %v1661_v12 = vadd.s32 %v1660_v14, %v1656_v41  ;;  %v1719_v60 = vand.u32 31, %v1717_v26  ;;  %v1389_v32 = vxor.u32 2147483648, %v4084_v42  ;;  %2588 = vsinq.f32 %v1481_v24 }
 0x26d   : > { %v1572_v17 = vor.u32 %v1571_v48, %v1570_v54  ;;  %v1575_v33 = vshll.u32 %v1574_v45, 23  ;;  %v1584_v9 = vsel %vm1499_vm2, %v1583_v34, %v4027_v62  ;;  %v1713_v55 = vor.u32 8388608, %v1712_v19 }
 0x26e   : > { %v1662_v2 = vadd.s32 536870912, %v1661_v12  ;;  %v1720_v43 = vsub.s32 32, %v1719_v60  ;;  %v4112_v63 = vshrl.u32 %v1717_v26, 5  ;;  %v1722_v51 = vshll.u32 %v4712_v13, %v1719_v60 }
 0x26f   : > { %v1576_v57 = vor.u32 4788187, %v1575_v33  ;;  %v1725_v1 = vshll.u32 %v4700_v36, %v1719_v60  ;;  %v1579_v50 = vcvt.s32.f32 %v1572_v17  ;;  %vm1385_vm14 = vcmp.eq.s32.totalorder %v4064_v8, 0 }
 0x270   : > { %v4116_v47 = vshrl.u32 %v1662_v2, 30  ;;  %v1723_v38 = vshrl.u32 %v4700_v36, %v1720_v43  ;;  %v1726_v29 = vshrl.u32 %v4701_v6, %v1720_v43  ;;  %v2585_v30 = vpop.eup %2584  ;;  %v1729_v44 = vshrl.u32 %v4702_v58, %v1720_v43 }
 0x271   : > { %v1577_v62 = vand.u32 2147483647, %v1576_v57  ;;  %v1731_v53 = vshll.u32 %v4702_v58, %v1719_v60  ;;  %v1732_v37 = vshrl.u32 %v4717_v11, %v1720_v43  ;;  %v1728_v24 = vshll.u32 %v4701_v6, %v1719_v60 }
 0x272   : > { %v1664_v46 = vshll.u32 %v4116_v47, 30  ;;  %v1724_v23 = vor.u32 %v1723_v38, %v1722_v51  ;;  %v1727_v31 = vor.u32 %v1726_v29, %v1725_v1  ;;  %v1734_v26 = vshll.u32 %v4717_v11, %v1719_v60 }
 0x273   : > { %v1580_v25 = vmul.f32 %v1579_v50, %v1577_v62  ;;  %v1733_v56 = vor.u32 %v1732_v37, %v1731_v53  ;;  %v1735_v34 = vshrl.u32 %v4718_v18, %v1720_v43  ;;  %v1386_v41 = vxor.u32 2147483648, %v2585_v30 }
 0x274   : > { %v4130_v19 = vsel %vm1388_vm12, %v1389_v32, %v2585_v30  ;;  %v4132_v54 = vsub.s32 %v1661_v12, %v1664_v46  ;;  %v1730_v48 = vor.u32 %v1729_v44, %v1728_v24  ;;  %v1586_v14 = vsel %vm4104_vm13, 0, %v1584_v9 }
 0x275   : > { %v1581_v45 = vxor.u32 2147483648, %v1580_v25  ;;  %v1736_v17 = vor.u32 %v1735_v34, %v1734_v26  ;;  %vm1737_vm15 = vcmp.lt.s32.totalorder %v4112_v63, 1  ;;  %v4137_v33 = vpop.eup %2586  ;;  %vm1740_vm0 = vcmp.lt.s32.totalorder %v4112_v63, 4 }
 0x276   : > { %v1667_v60 = vsub.s32 0, %v4132_v54  ;;  %v1745_v32 = vsel %vm1737_vm15, %v1724_v23, %v1727_v31  ;;  %v1753_v2 = vshll.u32 %v1713_v55, 8  ;;  %v2589_v12 = vpop.eup %2588  ;;  %vm1738_vm1 = vcmp.lt.s32.totalorder %v4112_v63, 2 }
 0x277   : > { %v1582_v57 = vsel %vm1499_vm2, %v1581_v45, %v1580_v25  ;;  %vm1739_vm10 = vcmp.lt.s32.totalorder %v4112_v63, 3  ;;  %v1746_v9 = vsel %vm1740_vm0, %v1733_v56, 920167782  ;;  %v1721_v1 = vshrl.u32 %v4712_v13, %v1720_v43 }
 0x278   : > { %v2375_v51 = vmin.u32 %v1667_v60, %v4132_v54  ;;  %v1742_v50 = vsel %vm1740_vm0, %v1730_v48, 2102212464  ;;  %v1747_v38 = vsel %vm1739_vm10, %v1730_v48, %v1746_v9  ;;  %v1585_v55 = vsel %vm4104_vm13, %v3255_v59, %v1582_v57 }
 0x279   : > { %v1748_v29 = vsel %vm1738_vm1, %v1745_v32, %v1747_v38  ;;  %v1749_v30 = vsel %vm1737_vm15, %v1727_v31, %v1730_v48  ;;  %v1750_v62 = vsel %vm1740_vm0, %v1736_v17, 1326507024  ;;  %v1387_v44 = vsel %vm1385_vm14, %v4084_v42, %v1386_v41 }
 0x27a   : > { %vm1492_vm3 = vcmp.eq.s32.totalorder %v4100_v5, 2  ;;  %v1590_v43 = vadd.s32 3, %v1586_v14  ;;  %v1669_v53 = vclz %v2375_v51  ;;  %v1741_v37 = vsel %vm1737_vm15, %v1721_v1, %v1724_v23 }
 0x27b   : > { %vm1489_vm4 = vcmp.eq.s32.totalorder %v4100_v5, 0  ;;  %v1743_v10 = vsel %vm1739_vm10, %v1727_v31, %v1742_v50  ;;  %v1751_v46 = vsel %vm1739_vm10, %v1733_v56, %v1750_v62  ;;  %2590 = vcosq.f32 %v1585_v55 }
 0x27c   : > { %v4169_v24 = vmul.u32.u64.low %v1753_v2, %v1748_v29  ;;  %v4170_v25 = vmul.u32.u64.high %v1753_v2, %v1748_v29, %v4169_v24  ;;  %vm1603_vm5 = vcmp.lt.s32.totalorder %v3274_v39, 0  ;;  %v2376_v42 = vadd.s32 4294967294, %v1669_v53 }
 0x27d   : > { %v1752_v26 = vsel %vm1738_vm1, %v1749_v30, %v1751_v46  ;;  %v1812_v23 = vand.u32 2139095040, %v3289_v4  ;;  %vm1384_vm6 = vcmp.lt.s32.totalorder %v4064_v8, 2  ;;  %2592 = vsinq.f32 %v1585_v55 }
 0x27e   : > { %v4177_v34 = vmul.u32.u64.low %v1753_v2, %v1752_v26  ;;  %v4178_v31 = vmul.u32.u64.high %v1753_v2, %v1752_v26, %v4177_v34  ;;  %v1809_v56 = vand.u32 2147483647, %v3289_v4  ;;  %v1493_v41 = vxor.u32 2147483648, %v4137_v33 }
 0x27f   : > { %vm2377_vm11 = vcmp.lt.s32.totalorder %v2376_v42, 0  ;;  %v1744_v48 = vsel %vm1738_vm1, %v1741_v37, %v1743_v10  ;;  %v1813_v45 = vshrl.u32 %v1812_v23, 23  ;;  %v1490_v14 = vxor.u32 2147483648, %v2589_v12 }
 0x280   : > { %vm4186_vm2 = vcmp.le.f32.partialorder %v1601_v0, 0.7853982  ;;  %v1657_v60 = vadd.s32 %v4069_v20, %v4080_v7  ;;  %v1672_v32 = vsel %vm2377_vm11, 0, %v2376_v42  ;;  %v1763_v57 = vadd.s32 1, %v4170_v25 }
 0x281   : > { %v1673_v9 = vsub.s32 32, %v1672_v32  ;;  %v1677_v51 = vsub.s32 4294967266, %v1672_v32  ;;  %v1687_v1 = vsub.s32 4, %v4116_v47  ;;  %v2382_v63 = vadd.s32 4294967169, %v1813_v45 }
 0x282   : > { %v1674_v50 = vshll.u32 %v4132_v54, %v1672_v32  ;;  %v1760_v38 = vmul.u32 %v1753_v2, %v1744_v48  ;;  %vm1762_vm7 = vc.u32 %v4178_v31, %v4169_v24  ;;  %v1816_v0 = vand.u32 8388607, %v1809_v56 }
 0x283   : > { %v1675_v55 = vshrl.u32 %v1657_v60, %v1673_v9  ;;  %v1678_v29 = vadd.s32 127, %v1677_v51  ;;  %v1764_v20 = vsel %vm1762_vm7, %v1763_v57, %v4170_v25  ;;  %v1819_v7 = vadd.s32 1, %v2382_v63 }
 0x284   : > { %v1494_v30 = vsel %vm1492_vm3, %v1493_v41, %v2589_v12  ;;  %v4201_v62 = vand.u32 3, %v1590_v43  ;;  %v1765_v53 = vadd.s32 %v1764_v20, %v1760_v38  ;;  %v1916_v37 = vand.u32 2139095040, %v3340_v52 }
 0x285   : > { %v1491_v54 = vsel %vm1489_vm4, %v4137_v33, %v1490_v14  ;;  %v1676_v2 = vor.u32 %v1675_v55, %v1674_v50  ;;  %v1679_v10 = vshll.u32 %v1678_v29, 23  ;;  %vm1820_vm8 = vcmp.gt.s32.totalorder %v1819_v7, 0  ;;  %v4212_v43 = vpop.eup %2590 }
 0x286   : > { %v4210_v46 = vsel %vm1603_vm5, %v1687_v1, %v4116_v47  ;;  %v1766_v25 = vadd.s32 536870912, %v1765_v53  ;;  %v1817_v42 = vor.u32 8388608, %v1816_v0  ;;  %v1821_v12 = vsel %vm1820_vm8, %v1819_v7, 0 }
 0x287   : > { %v4217_v26 = vsel %vm1384_vm6, %v1387_v44, %v4130_v19  ;;  %vm1488_vm9 = vcmp.lt.s32.totalorder %v4100_v5, 2  ;;  %v1680_v33 = vor.u32 4788187, %v1679_v10  ;;  %v1913_v23 = vand.u32 2147483647, %v3340_v52  ;;  %v4221_v34 = vpop.eup %2592 }
 0x288   : > { %vm1596_vm12 = vcmp.eq.s32.totalorder %v4201_v62, 2  ;;  %v1767_v47 = vshrl.u32 %v1766_v25, 30  ;;  %v1823_v41 = vand.u32 31, %v1821_v12  ;;  %v1917_v48 = vshrl.u32 %v1916_v37, 23 }
 0x289   : > { %v4224_v45 = vsel %vm1488_vm9, %v1491_v54, %v1494_v30  ;;  %v1681_v14 = vand.u32 2147483647, %v1680_v33  ;;  %v1683_v60 = vcvt.s32.f32 %v1676_v2  ;;  %v1690_v8 = vsel %vm4186_vm2, 0, %v4210_v46 }
 0x28a   : > { %vm1707_vm13 = vcmp.lt.s32.totalorder %v3278_v28, 0  ;;  %v4231_v5 = vadd.s32 %v4169_v24, %v4178_v31  ;;  %v1768_v19 = vshll.u32 %v1767_v47, 30  ;;  %v1824_v44 = vsub.s32 32, %v1823_v41 }
 0x28b   : > { %v4233_v32 = vshll.u32 %v1817_v42, 8  ;;  %v1594_v57 = vxor.u32 2147483648, %v4221_v34  ;;  %v1597_v9 = vxor.u32 2147483648, %v4212_v43  ;;  %v1684_v51 = vmul.f32 %v1683_v60, %v1681_v14 }
 0x28c   : > { %v4239_v1 = vand.u32 8388607, %v1913_v23  ;;  %v4241_v63 = vsub.s32 %v1765_v53, %v1768_v19  ;;  %v4243_v50 = vshrl.u32 %v1821_v12, 5  ;;  %v1827_v24 = vshrl.u32 %v4700_v36, %v1824_v44 }
 0x28d   : > { %v2386_v31 = vadd.s32 4294967169, %v1917_v48  ;;  %v1685_v38 = vxor.u32 2147483648, %v1684_v51  ;;  %v1826_v0 = vshll.u32 %v4712_v13, %v1823_v41  ;;  %v1830_v55 = vshrl.u32 %v4701_v6, %v1824_v44 }
 0x28e   : > { %v1833_v29 = vshrl.u32 %v4702_v58, %v1824_v44  ;;  %v1771_v20 = vsub.s32 0, %v4241_v63  ;;  %v1791_v7 = vsub.s32 4, %v1767_v47  ;;  %v1829_v30 = vshll.u32 %v4700_v36, %v1823_v41 }
 0x28f   : > { %v1832_v53 = vshll.u32 %v4701_v6, %v1823_v41  ;;  %vm1593_vm14 = vcmp.eq.s32.totalorder %v4201_v62, 0  ;;  %v4256_v37 = vsel %vm1596_vm12, %v1597_v9, %v4221_v34  ;;  %vm4260_vm15 = vcmp.le.f32.partialorder %v1705_v16, 0.7853982 }
 0x290   : > { %v1828_v2 = vor.u32 %v1827_v24, %v1826_v0  ;;  %v1835_v10 = vshll.u32 %v4702_v58, %v1823_v41  ;;  %v1836_v25 = vshrl.u32 %v4717_v11, %v1824_v44  ;;  %v1686_v42 = vsel %vm1603_vm5, %v1685_v38, %v1684_v51 }
 0x291   : > { %v2379_v12 = vmin.u32 %v1771_v20, %v4241_v63  ;;  %v1831_v33 = vor.u32 %v1830_v55, %v1829_v30  ;;  %v1834_v48 = vor.u32 %v1833_v29, %v1832_v53  ;;  %v1838_v14 = vshll.u32 %v4717_v11, %v1823_v41 }
 0x292   : > { %v1837_v34 = vor.u32 %v1836_v25, %v1835_v10  ;;  %v1839_v16 = vshrl.u32 %v4718_v18, %v1824_v44  ;;  %vm1841_vm0 = vcmp.lt.s32.totalorder %v4243_v50, 1  ;;  %v1792_v19 = vsel %vm1707_vm13, %v1791_v7, %v1767_v47 }
 0x293   : > { %v1773_v60 = vclz %v2379_v12  ;;  %v1825_v9 = vshrl.u32 %v4712_v13, %v1824_v44  ;;  %vm1842_vm1 = vcmp.lt.s32.totalorder %v4243_v50, 2  ;;  %v1689_v51 = vsel %vm4186_vm2, %v3274_v39, %v1686_v42 }
 0x294   : > { %v1840_v24 = vor.u32 %v1839_v16, %v1838_v14  ;;  %vm1843_vm10 = vcmp.lt.s32.totalorder %v4243_v50, 3  ;;  %vm1844_vm3 = vcmp.lt.s32.totalorder %v4243_v50, 4  ;;  %vm1592_vm4 = vcmp.lt.s32.totalorder %v4201_v62, 2 }
 0x295   : > { %v2380_v41 = vadd.s32 4294967294, %v1773_v60  ;;  %v1846_v38 = vsel %vm1844_vm3, %v1834_v48, 2102212464  ;;  %v1849_v47 = vsel %vm1841_vm0, %v1828_v2, %v1831_v33  ;;  %v1850_v0 = vsel %vm1844_vm3, %v1837_v34, 920167782 }
 0x296   : > { %vm1277_vm5 = vweird.f32 %v3228_v40  ;;  %vm1381_vm6 = vweird.f32 %v3241_v21  ;;  %v1845_v44 = vsel %vm1841_vm0, %v1825_v9, %v1828_v2  ;;  %v1851_v55 = vsel %vm1843_vm10, %v1834_v48, %v1850_v0 }
 0x297   : > { %v1853_v29 = vsel %vm1841_vm0, %v1831_v33, %v1834_v48  ;;  %v1854_v20 = vsel %vm1844_vm3, %v1840_v24, 1326507024  ;;  %vm1485_vm11 = vweird.f32 %v3245_v49  ;;  %vm2381_vm7 = vcmp.lt.s32.totalorder %v2380_v41, 0 }
 0x298   : > { %v1847_v7 = vsel %vm1843_vm10, %v1831_v33, %v1846_v38  ;;  %v1852_v30 = vsel %vm1842_vm1, %v1849_v47, %v1851_v55  ;;  %v1855_v53 = vsel %vm1843_vm10, %v1837_v34, %v1854_v20  ;;  %vm1589_vm8 = vweird.f32 %v3255_v59  ;;  %v4738_v20 = vld [vmem:[#allocation10_spill] sm:$0xff] }
 0x299   : > { %v1776_v2 = vsel %vm2381_vm7, 0, %v2380_v41  ;;  %v1856_v10 = vsel %vm1842_vm1, %v1853_v29, %v1855_v53  ;;  %v4303_v25 = vmul.u32.u64.low %v4233_v32, %v1852_v30  ;;  %v4304_v42 = vmul.u32.u64.high %v4233_v32, %v1852_v30, %v4303_v25 }
 0x29a   : > { %v1595_v12 = vsel %vm1593_vm14, %v4212_v43, %v1594_v57  ;;  %v1777_v33 = vsub.s32 32, %v1776_v2  ;;  %v1781_v48 = vsub.s32 4294967266, %v1776_v2  ;;  %v1794_v34 = vsel %vm4260_vm15, 0, %v1792_v19 }
 0x29b   : > { %2594 = vcosq.f32 %v1689_v51  ;;  %v4313_v14 = vmul.u32.u64.low %v4233_v32, %v1856_v10  ;;  %v4314_v16 = vmul.u32.u64.high %v4233_v32, %v1856_v10, %v4313_v14  ;;  %v1923_v60 = vadd.s32 1, %v2386_v31 }
 0x29c   : > { %v1778_v9 = vshll.u32 %v4241_v63, %v1776_v2  ;;  %v1779_v24 = vshrl.u32 %v4231_v5, %v1777_v33  ;;  %v1782_v41 = vadd.s32 127, %v1781_v48  ;;  %v1848_v38 = vsel %vm1842_vm1, %v1845_v44, %v1847_v7 }
 0x29d   : > { %2596 = vsinq.f32 %v1689_v51  ;;  %v1694_v43 = vadd.s32 3, %v1690_v8  ;;  %v1867_v57 = vadd.s32 1, %v4304_v42  ;;  %vm1924_vm9 = vcmp.gt.s32.totalorder %v1923_v60, 0 }
 0x29e   : > { %v1780_v19 = vor.u32 %v1779_v24, %v1778_v9  ;;  %v1783_v47 = vshll.u32 %v1782_v41, 23  ;;  %v1798_v31 = vadd.s32 3, %v1794_v34  ;;  %v1925_v0 = vsel %vm1924_vm9, %v1923_v60, 0 }
 0x29f   : > { %v1599_v5 = vsel %vm1592_vm4, %v1595_v12, %v4256_v37  ;;  %v1864_v63 = vmul.u32 %v4233_v32, %v1848_v38  ;;  %vm1866_vm12 = vc.u32 %v4314_v16, %v4303_v25  ;;  %v1921_v17 = vor.u32 8388608, %v4239_v1 }
 0x2a0   : > { %v4335_v46 = vsel %vm1277_vm5, nan, %v4062_v3  ;;  %v4340_v8 = vsel %vm1381_vm6, nan, %v4217_v26  ;;  %v1784_v50 = vor.u32 4788187, %v1783_v47  ;;  %v1868_v62 = vsel %vm1866_vm12, %v1867_v57, %v4304_v42 }
 0x2a1   : > { %v4346_v32 = vsel %vm1485_vm11, nan, %v4224_v45  ;;  %v4348_v37 = vand.u32 3, %v1694_v43  ;;  %v1869_v1 = vadd.s32 %v1868_v62, %v1864_v63  ;;  %v1927_v51 = vand.u32 31, %v1925_v0 }
 0x2a2   : > { %v4352_v40 = vsel %vm1589_vm8, nan, %v1599_v5  ;;  %v1785_v3 = vand.u32 2147483647, %v1784_v50  ;;  %v1787_v21 = vcvt.s32.f32 %v1780_v19  ;;  %v4354_v26 = vand.u32 3, %v1798_v31 }
 0x2a3   : > { %v1870_v44 = vadd.s32 536870912, %v1869_v1  ;;  %v1928_v55 = vsub.s32 32, %v1927_v51  ;;  %v4356_v29 = vshll.u32 %v1921_v17, 8  ;;  %v2017_v49 = vand.u32 2147483647, %v4738_v20 }
 0x2a4   : > { %v1788_v45 = vmul.f32 %v1787_v21, %v1785_v3  ;;  %v4359_v7 = vshrl.u32 %v1925_v0, 5  ;;  %v1930_v30 = vshll.u32 %v4712_v13, %v1927_v51  ;;  %v1933_v53 = vshll.u32 %v4700_v36, %v1927_v51 }
 0x2a5   : > { %v2595_v59 = vpop.eup %2594  ;;  %vm1811_vm2 = vcmp.lt.s32.totalorder %v3289_v4, 0  ;;  %v1871_v2 = vshrl.u32 %v1870_v44, 30  ;;  %v1931_v10 = vshrl.u32 %v4700_v36, %v1928_v55  ;;  %v1934_v42 = vshrl.u32 %v4701_v6, %v1928_v55 }
 0x2a6   : > { %v1936_v12 = vshll.u32 %v4701_v6, %v1927_v51  ;;  %vm1700_vm14 = vcmp.eq.s32.totalorder %v4348_v37, 2  ;;  %v1789_v33 = vxor.u32 2147483648, %v1788_v45  ;;  %v1937_v48 = vshrl.u32 %v4702_v58, %v1928_v55 }
 0x2a7   : > { %v1939_v34 = vshll.u32 %v4702_v58, %v1927_v51  ;;  %v1940_v14 = vshrl.u32 %v4717_v11, %v1928_v55  ;;  %v2597_v60 = vpop.eup %2596  ;;  %v1872_v9 = vshll.u32 %v1871_v2, 30  ;;  %v1932_v24 = vor.u32 %v1931_v10, %v1930_v30 }
 0x2a8   : > { %v1935_v41 = vor.u32 %v1934_v42, %v1933_v53  ;;  %v1942_v38 = vshll.u32 %v4717_v11, %v1927_v51  ;;  %vm1697_vm0 = vcmp.eq.s32.totalorder %v4348_v37, 0  ;;  %v1790_v43 = vsel %vm1707_vm13, %v1789_v33, %v1788_v45 }
 0x2a9   : > { %vm4377_vm1 = vcmp.le.f32.partialorder %v1809_v56, 0.7853982  ;;  %v1938_v19 = vor.u32 %v1937_v48, %v1936_v12  ;;  %v1941_v47 = vor.u32 %v1940_v14, %v1939_v34  ;;  %v1943_v31 = vshrl.u32 %v4718_v18, %v1928_v55 }
 0x2aa   : > { %v1701_v0 = vxor.u32 2147483648, %v2595_v59  ;;  %v1793_v5 = vsel %vm4260_vm15, %v3278_v28, %v1790_v43  ;;  %v4385_v63 = vsub.s32 %v1869_v1, %v1872_v9  ;;  %v2020_v17 = vand.u32 2139095040, %v4738_v20 }
 0x2ab   : > { %v1698_v50 = vxor.u32 2147483648, %v2597_v60  ;;  %2598 = vcosq.f32 %v1793_v5  ;;  %v1895_v62 = vsub.s32 4, %v1871_v2  ;;  %v1944_v56 = vor.u32 %v1943_v31, %v1942_v38 }
 0x2ac   : > { %vm1696_vm13 = vcmp.lt.s32.totalorder %v4348_v37, 2  ;;  %2600 = vsinq.f32 %v1793_v5  ;;  %v1875_v51 = vsub.s32 0, %v4385_v63  ;;  %vm1945_vm10 = vcmp.lt.s32.totalorder %v4359_v7, 1  ;;  %v2156_v5 = vpop.permute.xlu0 %2155 }
 0x2ad   : > { %vm1948_vm3 = vcmp.lt.s32.totalorder %v4359_v7, 4  ;;  %vm1947_vm4 = vcmp.lt.s32.totalorder %v4359_v7, 3  ;;  %v1953_v1 = vsel %vm1945_vm10, %v1932_v24, %v1935_v41  ;;  %v1929_v44 = vshrl.u32 %v4712_v13, %v1928_v55 }
 0x2ae   : > { %v1950_v54 = vsel %vm1948_vm3, %v1938_v19, 2102212464  ;;  %v1954_v3 = vsel %vm1948_vm3, %v1941_v47, 920167782  ;;  %v2383_v21 = vmin.u32 %v1875_v51, %v4385_v63  ;;  %vm1946_vm15 = vcmp.lt.s32.totalorder %v4359_v7, 2 }
 0x2af   : > { %v1955_v45 = vsel %vm1947_vm4, %v1938_v19, %v1954_v3  ;;  %v1896_v30 = vsel %vm1811_vm2, %v1895_v62, %v1871_v2  ;;  %v1957_v10 = vsel %vm1945_vm10, %v1935_v41, %v1938_v19  ;;  %v1958_v42 = vsel %vm1948_vm3, %v1944_v56, 1326507024 }
 0x2b0   : > { %v1956_v53 = vsel %vm1946_vm15, %v1953_v1, %v1955_v45  ;;  %v1702_v12 = vsel %vm1700_vm14, %v1701_v0, %v2597_v60  ;;  %v1877_v33 = vclz %v2383_v21  ;;  %v1949_v55 = vsel %vm1945_vm10, %v1929_v44, %v1932_v24 }
 0x2b1   : > { %v1951_v48 = vsel %vm1947_vm4, %v1935_v41, %v1950_v54  ;;  %vm1693_vm5 = vweird.f32 %v3274_v39  ;;  %v1959_v2 = vsel %vm1947_vm4, %v1941_v47, %v1958_v42  ;;  %v2021_v9 = vshrl.u32 %v2020_v17, 23  ;;  %v2164_v17 = vpop.permute.xlu1 %2163 }
 0x2b2   : > { %v4416_v34 = vmul.u32.u64.low %v4356_v29, %v1956_v53  ;;  %v4417_v14 = vmul.u32.u64.high %v4356_v29, %v1956_v53, %v4416_v34  ;;  %v1699_v60 = vsel %vm1697_vm0, %v2595_v59, %v1698_v50  ;;  %v2384_v38 = vadd.s32 4294967294, %v1877_v33 }
 0x2b3   : > { %v1898_v24 = vsel %vm4377_vm1, 0, %v1896_v30  ;;  %v1960_v41 = vsel %vm1946_vm15, %v1957_v10, %v1959_v2  ;;  %v1952_v43 = vsel %vm1946_vm15, %v1949_v55, %v1951_v48  ;;  %v2390_v31 = vadd.s32 4294967169, %v2021_v9  ;;  %v2160_v2 = vpop.permute.xlu0 %2159 }
 0x2b4   : > { %v4429_v19 = vmul.u32.u64.low %v4356_v29, %v1960_v41  ;;  %v4430_v47 = vmul.u32.u64.high %v4356_v29, %v1960_v41, %v4429_v19  ;;  %vm1801_vm6 = vcmp.eq.s32.totalorder %v4354_v26, 0  ;;  %vm1804_vm11 = vcmp.eq.s32.totalorder %v4354_v26, 2 }
 0x2b5   : > { %v1865_v59 = vadd.s32 %v4303_v25, %v4314_v16  ;;  %vm2385_vm7 = vcmp.lt.s32.totalorder %v2384_v38, 0  ;;  %v2599_v0 = vpop.eup %2598  ;;  %v1703_v7 = vsel %vm1696_vm13, %v1699_v60, %v1702_v12  ;;  %v1971_v62 = vadd.s32 1, %v4417_v14  ;;  %v4741_v16 = vld [vmem:[#allocation9_spill] sm:$0xff]  ;;  %v2168_v9 = vpop.permute.xlu1 %2167 }
 0x2b6   : > { %v1880_v50 = vsel %vm2385_vm7, 0, %v2384_v38  ;;  %v2027_v56 = vadd.s32 1, %v2390_v31  ;;  %v2601_v51 = vpop.eup %2600  ;;  %v1902_v3 = vadd.s32 3, %v1898_v24  ;;  %v1968_v21 = vmul.u32 %v4356_v29, %v1952_v43 }
 0x2b7   : > { %v1881_v54 = vsub.s32 32, %v1880_v50  ;;  %v1885_v1 = vsub.s32 4294967266, %v1880_v50  ;;  %vm1970_vm8 = vc.u32 %v4430_v47, %v4416_v34  ;;  %v4444_v25 = vand.u32 8388607, %v2017_v49 }
 0x2b8   : > { %vm2028_vm9 = vcmp.gt.s32.totalorder %v2027_v56, 0  ;;  %vm2121_vm12 = vcmp.eq.s32.totalorder %v4741_v16, 32  ;;  %v1882_v37 = vshll.u32 %v4385_v63, %v1880_v50  ;;  %v1972_v30 = vsel %vm1970_vm8, %v1971_v62, %v4417_v14 }
 0x2b9   : > { %v1883_v44 = vshrl.u32 %v1865_v59, %v1881_v54  ;;  %v1886_v45 = vadd.s32 127, %v1885_v1  ;;  %v1802_v53 = vxor.u32 2147483648, %v2601_v51  ;;  %v1805_v10 = vxor.u32 2147483648, %v2599_v0 }
 0x2ba   : > { %v1973_v29 = vadd.s32 %v1972_v30, %v1968_v21  ;;  %v2029_v42 = vsel %vm2028_vm9, %v2027_v56, 0  ;;  %v4451_v12 = vsel %vm1693_vm5, nan, %v1703_v7  ;;  %v4453_v48 = vand.u32 3, %v1902_v3 }
 0x2bb   : > { %v1884_v33 = vor.u32 %v1883_v44, %v1882_v37  ;;  %v1887_v55 = vshll.u32 %v1886_v45, 23  ;;  %v2025_v60 = vor.u32 8388608, %v4444_v25  ;;  %v2031_v38 = vand.u32 31, %v2029_v42 }
 0x2bc   : > { %v1974_v63 = vadd.s32 536870912, %v1973_v29  ;;  %v4458_v14 = vsel %vm2121_vm12, %v2156_v5, 0.0  ;;  %v4466_v24 = vsel %vm2121_vm12, %v2160_v2, 0.0  ;;  %v4470_v41 = vsel %vm2121_vm12, %v2164_v17, 0.0 }
 0x2bd   : > { %v1888_v39 = vor.u32 4788187, %v1887_v55  ;;  %v4474_v43 = vsel %vm2121_vm12, %v2168_v9, 0.0  ;;  %v1803_v19 = vsel %vm1801_vm6, %v2599_v0, %v1802_v53  ;;  %v1806_v31 = vsel %vm1804_vm11, %v1805_v10, %v2601_v51 }
 0x2be   : > { %v4480_v59 = vshrl.u32 %v1974_v63, 30  ;;  %v2032_v5 = vsub.s32 32, %v2031_v38  ;;  %vm1800_vm14 = vcmp.lt.s32.totalorder %v4354_v26, 2  ;;  %v1891_v50 = vcvt.s32.f32 %v1884_v33  ;;  %v2172_v26 = vpop.permute.xlu0 %2171 }
 0x2bf   : > { %v1889_v7 = vand.u32 2147483647, %v1888_v39  ;;  %v2030_v62 = vshrl.u32 %v2029_v42, 5  ;;  %v2034_v17 = vshll.u32 %v4712_v13, %v2031_v38  ;;  %v2037_v0 = vshll.u32 %v4700_v36, %v2031_v38 }
 0x2c0   : > { %v1976_v56 = vshll.u32 %v4480_v59, 30  ;;  %v2035_v54 = vshrl.u32 %v4700_v36, %v2032_v5  ;;  %v2040_v51 = vshll.u32 %v4701_v6, %v2031_v38  ;;  %v2038_v3 = vshrl.u32 %v4701_v6, %v2032_v5 }
 0x2c1   : > { %v1892_v1 = vmul.f32 %v1891_v50, %v1889_v7  ;;  %v2041_v21 = vshrl.u32 %v4702_v58, %v2032_v5  ;;  %v2044_v25 = vshrl.u32 %v4717_v11, %v2032_v5  ;;  %vm456_vm0 = vcmp.lt.s32.totalorder %v4741_v16, 32 }
 0x2c2   : > { %vm1797_vm13 = vweird.f32 %v3278_v28  ;;  %v4494_v37 = vsub.s32 %v1973_v29, %v1976_v56  ;;  %v2036_v44 = vor.u32 %v2035_v54, %v2034_v17  ;;  %v2043_v36 = vshll.u32 %v4702_v58, %v2031_v38 }
 0x2c3   : > { %v2047_v45 = vshrl.u32 %v4718_v18, %v2032_v5  ;;  %v1893_v30 = vxor.u32 2147483648, %v1892_v1  ;;  %v2039_v53 = vor.u32 %v2038_v3, %v2037_v0  ;;  %v2042_v10 = vor.u32 %v2041_v21, %v2040_v51 }
 0x2c4   : > { %v2046_v6 = vshll.u32 %v4717_v11, %v2031_v38  ;;  %v1979_v42 = vsub.s32 0, %v4494_v37  ;;  %v2033_v33 = vshrl.u32 %v4712_v13, %v2032_v5  ;;  %v2045_v29 = vor.u32 %v2044_v25, %v2043_v36 }
 0x2c5   : > { %vm2049_vm10 = vcmp.lt.s32.totalorder %v2030_v62, 1  ;;  %v1894_v58 = vsel %vm1811_vm2, %v1893_v30, %v1892_v1  ;;  %vm2051_vm3 = vcmp.lt.s32.totalorder %v2030_v62, 3  ;;  %vm2052_vm4 = vcmp.lt.s32.totalorder %v2030_v62, 4 }
 0x2c6   : > { %v2048_v55 = vor.u32 %v2047_v45, %v2046_v6  ;;  %v1897_v11 = vsel %vm4377_vm1, %v3289_v4, %v1894_v58  ;;  %v2387_v18 = vmin.u32 %v1979_v42, %v4494_v37  ;;  %v2053_v2 = vsel %vm2049_vm10, %v2033_v33, %v2036_v44 }
 0x2c7   : > { %v2054_v9 = vsel %vm2052_vm4, %v2042_v10, 2102212464  ;;  %2602 = vcosq.f32 %v1897_v11  ;;  %v2057_v63 = vsel %vm2049_vm10, %v2036_v44, %v2039_v53  ;;  %v2058_v38 = vsel %vm2052_vm4, %v2045_v29, 920167782  ;;  %v4742_v44 = vld [vmem:[#allocation11_spill] sm:$0xff] }
 0x2c8   : > { %v2055_v13 = vsel %vm2051_vm3, %v2039_v53, %v2054_v9  ;;  %v1807_v39 = vsel %vm1800_vm14, %v1803_v19, %v1806_v31  ;;  %2604 = vsinq.f32 %v1897_v11  ;;  %v1981_v57 = vclz %v2387_v18 }
 0x2c9   : > { %vm2050_vm2 = vcmp.lt.s32.totalorder %v2030_v62, 2  ;;  %v2059_v7 = vsel %vm2051_vm3, %v2042_v10, %v2058_v38  ;;  %v2061_v50 = vsel %vm2049_vm10, %v2039_v53, %v2042_v10  ;;  %v2065_v17 = vshll.u32 %v2025_v60, 8  ;;  %v4743_v53 = vld [vmem:[#allocation12_spill] sm:$0xff] }
 0x2ca   : > { %v2056_v5 = vsel %vm2050_vm2, %v2053_v2, %v2055_v13  ;;  %v1969_v56 = vadd.s32 %v4416_v34, %v4430_v47  ;;  %v2388_v54 = vadd.s32 4294967294, %v1981_v57  ;;  %v2060_v0 = vsel %vm2050_vm2, %v2057_v63, %v2059_v7 }
 0x2cb   : > { %v2062_v51 = vsel %vm2052_vm4, %v2048_v55, 1326507024  ;;  %v1808_v19 = vsel %vm1797_vm13, nan, %v1807_v39  ;;  %vm1908_vm1 = vcmp.eq.s32.totalorder %v4453_v48, 2  ;;  %vm1905_vm15 = vcmp.eq.s32.totalorder %v4453_v48, 0 }
 0x2cc   : > { %v2063_v60 = vsel %vm2051_vm3, %v2045_v29, %v2062_v51  ;;  %v4536_v34 = vmul.u32.u64.low %v2065_v17, %v2060_v0  ;;  %v4537_v47 = vmul.u32.u64.high %v2065_v17, %v2060_v0, %v4536_v34  ;;  %vm2389_vm5 = vcmp.lt.s32.totalorder %v2388_v54, 0 }
 0x2cd   : > { %v2064_v31 = vsel %vm2050_vm2, %v2061_v50, %v2063_v60  ;;  %v2072_v1 = vmul.u32 %v2065_v17, %v2056_v5  ;;  %v2190_v28 = vsel %vm2121_vm12, %v2172_v26, 0.0  ;;  %v1984_v3 = vsel %vm2389_vm5, 0, %v2388_v54 }
 0x2ce   : > { %v4544_v21 = vmul.u32.u64.low %v2065_v17, %v2064_v31  ;;  %v4545_v25 = vmul.u32.u64.high %v2065_v17, %v2064_v31, %v4544_v21  ;;  %v2194_v36 = vsel %vm456_vm0, %v4742_v44, %v4458_v14  ;;  %v1985_v45 = vsub.s32 32, %v1984_v3 }
 0x2cf   : > { %v1986_v62 = vshll.u32 %v4494_v37, %v1984_v3  ;;  %v1989_v30 = vsub.s32 4294967266, %v1984_v3  ;;  %v2195_v10 = vsel %vm456_vm0, %v4743_v53, %v4458_v14  ;;  %2210 = vst [vmem:[%s4530_s19] sm:$0xff] %v2194_v36  ;;  %v2075_v6 = vadd.s32 1, %v4537_v47  ;;  %v2176_v14 = vpop.permute.xlu1 %2175 }
 0x2d0   : > { %v2196_v42 = vsel %vm456_vm0, %v3703_v61, %v4466_v24  ;;  %v2197_v37 = vsel %vm456_vm0, %v3713_v15, %v4466_v24  ;;  %v2198_v33 = vsel %vm456_vm0, %v3907_v35, %v4470_v41  ;;  %2211 = vst [vmem:[%s4530_s19 + $0x8] sm:$0x3] %v2195_v10  ;;  %v1987_v29 = vshrl.u32 %v1969_v56, %v1985_v45  ;;  %v2180_v24 = vpop.permute.xlu0 %2179 }
 0x2d1   : > { %v1990_v58 = vadd.s32 127, %v1989_v30  ;;  %v2199_v61 = vsel %vm456_vm0, %v3931_v27, %v4470_v41  ;;  %v2200_v15 = vsel %vm456_vm0, %v4018_v22, %v4474_v43  ;;  %2212 = vst [vmem:[%s4530_s19 + $0x10] sm:$0xff] %v2196_v42  ;;  %2213 = vst [vmem:[%s4530_s19 + $0x18] sm:$0x3] %v2197_v37  ;;  %v2603_v35 = vpop.eup %2602  ;;  %vm2074_vm6 = vc.u32 %v4545_v25, %v4536_v34 }
 0x2d2   : > { %2214 = vst [vmem:[%s4530_s19 + $0x20] sm:$0xff] %v2198_v33  ;;  %v2191_v55 = vsel %vm2121_vm12, %v2176_v14, 0.0  ;;  %v2201_v27 = vsel %vm456_vm0, %v4335_v46, %v4474_v43  ;;  %v2202_v22 = vsel %vm456_vm0, %v4340_v8, %v2190_v28  ;;  %2215 = vst [vmem:[%s4530_s19 + $0x28] sm:$0x3] %v2199_v61  ;;  %v2605_v41 = vpop.eup %2604  ;;  %v1909_v11 = vxor.u32 2147483648, %v2603_v35 }
 0x2d3   : > { %2216 = vst [vmem:[%s4530_s19 + $0x30] sm:$0xff] %v2200_v15  ;;  %v1988_v18 = vor.u32 %v1987_v29, %v1986_v62  ;;  %v1991_v2 = vshll.u32 %v1990_v58, 23  ;;  %v2076_v9 = vsel %vm2074_vm6, %v2075_v6, %v4537_v47  ;;  %2217 = vst [vmem:[%s4530_s19 + $0x38] sm:$0x3] %v2201_v27  ;;  %v1906_v13 = vxor.u32 2147483648, %v2605_v41  ;;  %v2184_v14 = vpop.permute.xlu1 %2183 }
 0x2d4   : > { %2218 = vst [vmem:[%s4530_s19 + $0x40] sm:$0xff] %v2202_v22  ;;  %v2077_v63 = vadd.s32 %v2076_v9, %v2072_v1  ;;  %v2203_v46 = vsel %vm456_vm0, %v4346_v32, %v2190_v28  ;;  %v2204_v8 = vsel %vm456_vm0, %v4352_v40, %v2191_v55  ;;  %v1910_v43 = vsel %vm1908_vm1, %v1909_v11, %v2605_v41 }
 0x2d5   : > { %v1992_v38 = vor.u32 4788187, %v1991_v2  ;;  %v2192_v39 = vsel %vm2121_vm12, %v2180_v24, 0.0  ;;  %v2205_v57 = vsel %vm456_vm0, %v4451_v12, %v2191_v55  ;;  %2219 = vst [vmem:[%s4530_s19 + $0x48] sm:$0x3] %v2203_v46  ;;  %2220 = vst [vmem:[%s4530_s19 + $0x50] sm:$0xff] %v2204_v8  ;;  %v1907_v32 = vsel %vm1905_vm15, %v2603_v35, %v1906_v13 }
 0x2d6   : > { %vm1904_vm11 = vcmp.lt.s32.totalorder %v4453_v48, 2  ;;  %v2078_v40 = vadd.s32 536870912, %v2077_v63  ;;  %v2206_v5 = vsel %vm456_vm0, %v1808_v19, %v2192_v39  ;;  %2221 = vst [vmem:[%s4530_s19 + $0x58] sm:$0x3] %v2205_v57  ;;  %vm1901_vm7 = vweird.f32 %v3289_v4 }
 0x2d7   : > { %v1911_v7 = vsel %vm1904_vm11, %v1907_v32, %v1910_v43  ;;  %v1993_v50 = vand.u32 2147483647, %v1992_v38  ;;  %v1995_v17 = vcvt.s32.f32 %v1988_v18  ;;  %2222 = vst [vmem:[%s4530_s19 + $0x60] sm:$0xff] %v2206_v5  ;;  %v1999_v0 = vsub.s32 4, %v4480_v59 }
 0x2d8   : > { %v1912_v12 = vsel %vm1901_vm7, nan, %v1911_v7  ;;  %v2079_v56 = vshrl.u32 %v2078_v40, 30  ;;  %vm1915_vm8 = vcmp.lt.s32.totalorder %v3340_v52, 0  ;;  %vm1914_vm9 = vcmp.le.f32.partialorder %v1913_v23, 0.7853982 }
 0x2d9   : > { %v1996_v54 = vmul.f32 %v1995_v17, %v1993_v50  ;;  %v2207_v48 = vsel %vm456_vm0, %v1912_v12, %v2192_v39  ;;  %v2000_v60 = vsel %vm1915_vm8, %v1999_v0, %v4480_v59  ;;  %v2073_v62 = vadd.s32 %v4536_v34, %v4545_v25 }
 0x2da   : > { %v2080_v51 = vshll.u32 %v2079_v56, 30  ;;  %2223 = vst [vmem:[%s4530_s19 + $0x68] sm:$0x3] %v2207_v48  ;;  %v2002_v1 = vsel %vm1914_vm9, 0, %v2000_v60  ;;  %vm2005_vm4 = vweird.f32 %v3340_v52  ;;  %v2193_v24 = vsel %vm2121_vm12, %v2184_v14, 0.0 }
 0x2db   : > { %v1997_v26 = vxor.u32 2147483648, %v1996_v54  ;;  %v2006_v21 = vadd.s32 3, %v2002_v1  ;;  %v2103_v11 = vsub.s32 4, %v2079_v56  ;;  %vm2019_vm2 = vcmp.lt.s32.totalorder %v4738_v20, 0 }
 0x2dc   : > { %v2081_v19 = vsub.s32 %v2077_v63, %v2080_v51  ;;  %vm2018_vm1 = vcmp.le.f32.partialorder %v2017_v49, 0.7853982  ;;  %vm2109_vm6 = vweird.f32 %v4738_v20 }
 0x2dd   : > { %v1998_v4 = vsel %vm1915_vm8, %v1997_v26, %v1996_v54  ;;  %v2007_v36 = vand.u32 3, %v2006_v21  ;;  %v2104_v2 = vsel %vm2019_vm2, %v2103_v11, %v2079_v56 }
 0x2de   : > { %v2001_v47 = vsel %vm1914_vm9, %v3340_v52, %v1998_v4  ;;  %v2083_v31 = vsub.s32 0, %v2081_v19  ;;  %v2106_v13 = vsel %vm2018_vm1, 0, %v2104_v2 }
 0x2df   : > { %2606 = vcosq.f32 %v2001_v47  ;;  %vm2012_vm13 = vcmp.eq.s32.totalorder %v2007_v36, 2  ;;  %vm2009_vm10 = vcmp.eq.s32.totalorder %v2007_v36, 0  ;;  %vm2008_vm3 = vcmp.lt.s32.totalorder %v2007_v36, 2 }
 0x2e0   : > { %2608 = vsinq.f32 %v2001_v47  ;;  %v2391_v28 = vmin.u32 %v2083_v31, %v2081_v19  ;;  %v2110_v63 = vadd.s32 3, %v2106_v13 }
 0x2e2   : > { %v2085_v3 = vclz %v2391_v28  ;;  %v2111_v46 = vand.u32 3, %v2110_v63 }
 0x2e4   : > { %v2392_v44 = vadd.s32 4294967294, %v2085_v3  ;;  %vm2116_vm12 = vcmp.eq.s32.totalorder %v2111_v46, 2  ;;  %vm2113_vm15 = vcmp.eq.s32.totalorder %v2111_v46, 0  ;;  %vm2112_vm5 = vcmp.lt.s32.totalorder %v2111_v46, 2 }
 0x2e6   : > { %vm2393_vm14 = vcmp.lt.s32.totalorder %v2392_v44, 0 }
 0x2e7   : > { %v2088_v45 = vsel %vm2393_vm14, 0, %v2392_v44 }
 0x2e8   : > { %v2089_v23 = vsub.s32 32, %v2088_v45  ;;  %v2093_v30 = vsub.s32 4294967266, %v2088_v45  ;;  %v2090_v6 = vshll.u32 %v2081_v19, %v2088_v45 }
 0x2e9   : > { %v2607_v53 = vpop.eup %2606 }
 0x2ea   : > { %v2609_v59 = vpop.eup %2608  ;;  %v2013_v10 = vxor.u32 2147483648, %v2607_v53  ;;  %v2091_v42 = vshrl.u32 %v2073_v62, %v2089_v23  ;;  %v2094_v37 = vadd.s32 127, %v2093_v30 }
 0x2eb   : > { %v2010_v33 = vxor.u32 2147483648, %v2609_v59 }
 0x2ec   : > { %v2014_v29 = vsel %vm2012_vm13, %v2013_v10, %v2609_v59  ;;  %v2092_v58 = vor.u32 %v2091_v42, %v2090_v6  ;;  %v2095_v61 = vshll.u32 %v2094_v37, 23 }
 0x2ed   : > { %v2011_v15 = vsel %vm2009_vm10, %v2607_v53, %v2010_v33 }
 0x2ee   : > { %v2015_v34 = vsel %vm2008_vm3, %v2011_v15, %v2014_v29  ;;  %v2096_v25 = vor.u32 4788187, %v2095_v61  ;;  %v2099_v27 = vcvt.s32.f32 %v2092_v58 }
 0x2ef   : > { %v2016_v35 = vsel %vm2005_vm4, nan, %v2015_v34 }
 0x2f0   : > { %v2097_v55 = vand.u32 2147483647, %v2096_v25  ;;  %v2208_v22 = vsel %vm456_vm0, %v2016_v35, %v2193_v24 }
 0x2f1   : > { %2224 = vst [vmem:[%s4530_s19 + $0x70] sm:$0xff] %v2208_v22 }
 0x2f2   : > { %v2100_v41 = vmul.f32 %v2099_v27, %v2097_v55 }
 0x2f4   : > { %v2101_v18 = vxor.u32 2147483648, %v2100_v41 }
 0x2f6   : > { %v2102_v52 = vsel %vm2019_vm2, %v2101_v18, %v2100_v41 }
 0x2f7   : > { %v2105_v9 = vsel %vm2018_vm1, %v4738_v20, %v2102_v52 }
 0x2f8   : > { %2610 = vcosq.f32 %v2105_v9 }
 0x2f9   : > { %2612 = vsinq.f32 %v2105_v9 }
 0x302   : > { %v2611_v8 = vpop.eup %2610 }
 0x303   : > { %v2613_v43 = vpop.eup %2612  ;;  %v2117_v38 = vxor.u32 2147483648, %v2611_v8 }
 0x304   : > { %v2114_v39 = vxor.u32 2147483648, %v2613_v43 }
 0x305   : > { %v2118_v57 = vsel %vm2116_vm12, %v2117_v38, %v2613_v43 }
 0x306   : > { %v2115_v32 = vsel %vm2113_vm15, %v2611_v8, %v2114_v39 }
 0x307   : > { %v2119_v49 = vsel %vm2112_vm5, %v2115_v32, %v2118_v57 }
 0x308   : > { %v2120_v40 = vsel %vm2109_vm6, nan, %v2119_v49 }
 0x309   : > { %v2209_v5 = vsel %vm456_vm0, %v2120_v40, %v2193_v24 }
 0x30a   : > { %2225 = vst [vmem:[%s4530_s19 + $0x78] sm:$0x3] %v2209_v5 }
 0x30b PF: > { %p14_p6 = scmp.ge.s32.totalorder %s2872_s29, 4   ;;  %s4744_s12 = smov %s2730_s13 }
 0x30c   : > { %s4745_s13 = smov %s2734_s14  ;;  %s4746_s14 = smov %s2883_s5 }
 0x30d   : > { %s4747_s15 = smov %s2872_s29  ;;  %16 = sbr.rel (!%p14_p6) target bundleno = 4 (0x4), region = 80 }
 0x314   :  { %2250 = vsyncpa [#allocation3], 1 }
 0x315   :  { %2252 = vsyncpa [#allocation3 + $0x1], 1 }
 0x316   :  { %2253 = vsyncpa [#allocation5], 1 }

</bundles_post_ra>
